<compile_context>
chip_gen: v7x
topology: tpu7x:2x2x1
jax: 0.10.0
libtpu: 0.0.40
codegen_flags: <defaults>
</compile_context>

<pallas_src>
import jax
import jax.numpy as jnp
from jax import lax
from jax.experimental import pallas as pl
from jax.experimental.pallas import tpu as pltpu
import numpy as np


def make_deeplog_kernel(seq_len: int, batch: int, hidden_size: int, num_layers: int):
    """Pallas kernel: LSTM recurrence + final FC.

    Ref order:
      x2d   (T*B, E)  bf16   -- time-major flattened embeddings
      wih0  (E, 4H)   bf16   -- layer-0 input weights (projection hoisted)
      whh0  (H, 4H)   bf16   -- layer-0 recurrent weights
      b0    (1, 4H)   f32    -- layer-0 fused bias (b_ih + b_hh)
      [Wl (2H, 4H) bf16, bl (1, 4H) f32]  for layers 1..L-1  (W = [W_ih; W_hh])
      fcw   (H, Vp)   bf16   -- FC weights, padded to lane-dense Vp
      fcb   (1, Vp)   f32
      out   (B, Vp)   f32
    """
    T, B, H = seq_len, batch, hidden_size
    G = 4 * H

    def kernel(*refs):
        x2d_ref = refs[0]
        wih0_ref, whh0_ref, b0_ref = refs[1], refs[2], refs[3]
        layer_refs = refs[4:4 + 2 * (num_layers - 1)]
        fcw_ref = refs[4 + 2 * (num_layers - 1)]
        fcb_ref = refs[5 + 2 * (num_layers - 1)]
        out_ref = refs[6 + 2 * (num_layers - 1)]

        # ---- layer-0 input projection hoisted out of the serial recurrence ----
        # One well-shaped (T*B, E) @ (E, 4H) MXU matmul replaces T tiny per-step ones.
        xw0 = jnp.dot(x2d_ref[...], wih0_ref[...],
                      preferred_element_type=jnp.float32)            # (T*B, 4H) f32

        # ---- hoist weights & (broadcast) biases out of the time loop ----
        # NOTE: fine at H=32 (few vregs). For H >= 128 read refs inside the loop
        # instead (vld is cheap; hoisted weights would spill the register file).
        whh0 = whh0_ref[...]
        b0 = jnp.broadcast_to(b0_ref[...], (B, G))
        Ws = [layer_refs[2 * i][...] for i in range(num_layers - 1)]
        bs = [jnp.broadcast_to(layer_refs[2 * i + 1][...], (B, G))
              for i in range(num_layers - 1)]

        # lane mask selecting the g-gate column range [2H, 3H)
        lane = lax.broadcasted_iota(jnp.int32, (B, G), 1)
        g_mask = (lane >= 2 * H) & (lane < 3 * H)

        def activate(gates):
            # Two full-vreg EUP launches + one select, then split (PyTorch order i,f,g,o).
            act = jnp.where(g_mask, jnp.tanh(gates), jax.nn.sigmoid(gates))
            return (act[:, 0:H], act[:, H:2 * H],
                    act[:, 2 * H:3 * H], act[:, 3 * H:4 * H])

        h = [jnp.zeros((B, H), jnp.float32) for _ in range(num_layers)]
        c = [jnp.zeros((B, H), jnp.float32) for _ in range(num_layers)]

        # ---- fully unrolled time loop (T static & small) ----
        for t in range(T):
            # layer 0: input projection precomputed; only h @ W_hh remains per step
            gates = (xw0[t * B:(t + 1) * B]
                     + jnp.dot(h[0].astype(jnp.bfloat16), whh0,
                               preferred_element_type=jnp.float32)
                     + b0)
            i_g, f_g, g_g, o_g = activate(gates)
            c[0] = f_g * c[0] + i_g * g_g
            h[0] = o_g * jnp.tanh(c[0])

            # upper layers: single fused matmul [x_t ; h_{t-1}] @ [W_ih ; W_hh]
            for l in range(1, num_layers):
                xh = jnp.concatenate(
                    [h[l - 1].astype(jnp.bfloat16), h[l].astype(jnp.bfloat16)],
                    axis=1)                                            # (B, 2H) bf16
                gates = (jnp.dot(xh, Ws[l - 1],
                                 preferred_element_type=jnp.float32)
                         + bs[l - 1])
                i_g, f_g, g_g, o_g = activate(gates)
                c[l] = f_g * c[l] + i_g * g_g
                h[l] = o_g * jnp.tanh(c[l])

        # ---- final FC on the top-layer hidden at the last timestep (lane-dense out) ----
        out_ref[...] = (jnp.dot(h[num_layers - 1].astype(jnp.bfloat16),
                                fcw_ref[...],
                                preferred_element_type=jnp.float32)
                        + fcb_ref[...])

    return kernel


def init_params(key, vocab_size, embedding_dim, hidden_size, num_layers):
    """Deterministic synthetic parameter init matching the module's shapes."""
    ks = jax.random.split(key, 2 + 4 * num_layers + 2)
    ki = iter(ks)
    params = {}
    # nn.Embedding(vocab_size + 1, embedding_dim), init uniform_[0,1)
    params["embedding"] = jax.random.uniform(
        next(ki), (vocab_size + 1, embedding_dim), jnp.float32)
    scale = 1.0 / np.sqrt(hidden_size)
    w_ih, w_hh, b_ih, b_hh = [], [], [], []
    for l in range(num_layers):
        in_dim = embedding_dim if l == 0 else hidden_size
        w_ih.append(jax.random.uniform(next(ki), (4 * hidden_size, in_dim),
                                       jnp.float32, -scale, scale))
        w_hh.append(jax.random.uniform(next(ki), (4 * hidden_size, hidden_size),
                                       jnp.float32, -scale, scale))
        b_ih.append(jax.random.uniform(next(ki), (4 * hidden_size,),
                                       jnp.float32, -scale, scale))
        b_hh.append(jax.random.uniform(next(ki), (4 * hidden_size,),
                                       jnp.float32, -scale, scale))
    params["w_ih"], params["w_hh"] = w_ih, w_hh
    params["b_ih"], params["b_hh"] = b_ih, b_hh
    # nn.Linear(hidden_size, vocab_size)
    fc_scale = 1.0 / np.sqrt(hidden_size)
    params["fc_w"] = jax.random.uniform(next(ki), (vocab_size, hidden_size),
                                        jnp.float32, -fc_scale, fc_scale)
    params["fc_b"] = jax.random.uniform(next(ki), (vocab_size,),
                                        jnp.float32, -fc_scale, fc_scale)
    return params


def deeplog_forward(input0, params, *, hidden_size, num_layers, vocab_size):
    """input0: (B, T) int32 token ids (= features[0] in the PyTorch module).
    Returns (out0, out0), out0: (B, vocab_size) float32 logits."""
    B, T = input0.shape
    H = hidden_size
    V = vocab_size
    E = params["embedding"].shape[1]
    Vp = ((V + 127) // 128) * 128  # lane-dense padded vocab

    # Embedding gather (glue, plain JAX), then time-major flatten to (T*B, E).
    x = jnp.take(params["embedding"], input0, axis=0)            # (B, T, E)
    x2d = jnp.transpose(x, (1, 0, 2)).reshape(T * B, E).astype(jnp.bfloat16)

    args = [x2d]
    # layer 0: keep W_ih separate (its projection is hoisted in-kernel)
    args.append(params["w_ih"][0].T.astype(jnp.bfloat16))                    # (E, 4H)
    args.append(params["w_hh"][0].T.astype(jnp.bfloat16))                    # (H, 4H)
    args.append((params["b_ih"][0] + params["b_hh"][0])
                .reshape(1, -1).astype(jnp.float32))                         # (1, 4H)
    # layers >= 1: fuse [W_ih; W_hh] so each step is a single matmul
    for l in range(1, num_layers):
        W = jnp.concatenate([params["w_ih"][l].T, params["w_hh"][l].T], axis=0)
        args.append(W.astype(jnp.bfloat16))                                  # (2H, 4H)
        args.append((params["b_ih"][l] + params["b_hh"][l])
                    .reshape(1, -1).astype(jnp.float32))                     # (1, 4H)
    # FC, padded to lane-dense (H, Vp) / (1, Vp)
    fcw = jnp.zeros((H, Vp), jnp.bfloat16).at[:, :V].set(
        params["fc_w"].T.astype(jnp.bfloat16))
    fcb = jnp.zeros((1, Vp), jnp.float32).at[:, :V].set(
        params["fc_b"].reshape(1, -1).astype(jnp.float32))
    args += [fcw, fcb]

    kernel = make_deeplog_kernel(T, B, H, num_layers)
    # TODO(synk): for v7x with nontrivial batch, add a grid over batch tiles with
    # dimension_semantics=("parallel",) to use both TensorCores; at B=2 it is moot.
    out_p = pl.pallas_call(
        kernel,
        out_shape=jax.ShapeDtypeStruct((B, Vp), jnp.float32),
        in_specs=[pl.BlockSpec(memory_space=pltpu.MemorySpace.VMEM)] * len(args),
        out_specs=pl.BlockSpec(memory_space=pltpu.MemorySpace.VMEM),
    )(*args)
    out0 = out_p[:, :V]
    return out0, out0


def deeplog_reference(input0, params, *, hidden_size, num_layers, vocab_size):
    """Pure-JAX f32 reference (same math) for correctness checking."""
    H = hidden_size
    x = jnp.take(params["embedding"], input0, axis=0)  # (B, T, E)
    B = x.shape[0]
    inp = x
    for l in range(num_layers):
        wih_t = params["w_ih"][l].T
        whh_t = params["w_hh"][l].T
        b = params["b_ih"][l] + params["b_hh"][l]

        def cell(carry, x_t, wih_t=wih_t, whh_t=whh_t, b=b):
            h, c = carry
            gates = x_t @ wih_t + h @ whh_t + b
            i_g = jax.nn.sigmoid(gates[:, 0:H])
            f_g = jax.nn.sigmoid(gates[:, H:2 * H])
            g_g = jnp.tanh(gates[:, 2 * H:3 * H])
            o_g = jax.nn.sigmoid(gates[:, 3 * H:4 * H])
            c = f_g * c + i_g * g_g
            h = o_g * jnp.tanh(c)
            return (h, c), h

        init = (jnp.zeros((B, H), jnp.float32), jnp.zeros((B, H), jnp.float32))
        _, hs = lax.scan(cell, init, jnp.transpose(inp, (1, 0, 2)))
        inp = jnp.transpose(hs, (1, 0, 2))  # (B, T, H)
    out0 = inp[:, -1, :] @ params["fc_w"].T + params["fc_b"]
    return out0


if __name__ == "__main__":
    # Small, module-consistent shapes.
    batch = 2
    seq_len = 8
    hidden_size = 32
    num_layers = 2
    vocab_size = 20
    embedding_dim = 16

    key = jax.random.PRNGKey(0)
    k_param, k_data = jax.random.split(key)
    params = init_params(k_param, vocab_size, embedding_dim, hidden_size, num_layers)

    # features[0]: (B, T) token indices in [0, vocab_size] (embedding has vocab_size+1 rows)
    input0 = jax.random.randint(k_data, (batch, seq_len), 0, vocab_size + 1, dtype=jnp.int32)

    out0, out0_dup = deeplog_forward(
        input0, params,
        hidden_size=hidden_size, num_layers=num_layers, vocab_size=vocab_size)
    out0 = jax.block_until_ready(out0)

    ref = deeplog_reference(
        input0, params,
        hidden_size=hidden_size, num_layers=num_layers, vocab_size=vocab_size)
    ref = jax.block_until_ready(ref)

    assert out0.shape == (batch, vocab_size)
    # bf16 matmul operands -> relaxed tolerance vs the f32 reference.
    np.testing.assert_allclose(np.asarray(out0), np.asarray(ref), rtol=2e-2, atol=5e-2)
    print("KERNEL_OK")
</pallas_src>

<mosaic_0001>
module attributes {stable_mosaic.version = 11 : i64} {
  func.func @kernel(%arg0: memref<16x16xbf16, #tpu.memory_space<vmem>>, %arg1: memref<16x128xbf16, #tpu.memory_space<vmem>>, %arg2: memref<32x128xbf16, #tpu.memory_space<vmem>>, %arg3: memref<1x128xf32, #tpu.memory_space<vmem>>, %arg4: memref<64x128xbf16, #tpu.memory_space<vmem>>, %arg5: memref<1x128xf32, #tpu.memory_space<vmem>>, %arg6: memref<32x128xbf16, #tpu.memory_space<vmem>>, %arg7: memref<1x128xf32, #tpu.memory_space<vmem>>, %arg8: memref<2x128xf32, #tpu.memory_space<vmem>>) attributes {dimension_semantics = [], scalar_prefetch = 0 : i64, scratch_operands = 0 : i64, tpu.core_type = #tpu.core_type<tc>} {
    %c0 = arith.constant 0 : index
    %c0_0 = arith.constant 0 : index
    %0 = vector.load %arg0[%c0, %c0_0] : memref<16x16xbf16, #tpu.memory_space<vmem>>, vector<16x16xbf16>
    %c0_1 = arith.constant 0 : index
    %c0_2 = arith.constant 0 : index
    %1 = vector.load %arg1[%c0_1, %c0_2] : memref<16x128xbf16, #tpu.memory_space<vmem>>, vector<16x128xbf16>
    %cst = arith.constant dense<0.000000e+00> : vector<16x128xf32>
    %2 = tpu.matmul %0, %1, %cst {dimension_numbers = #tpu.dot_dimension_numbers<[1], [0], [0], [1], [0, 0, 1, 1], [], []>} : vector<16x16xbf16>, vector<16x128xbf16>, vector<16x128xf32> -> vector<16x128xf32>
    %c0_3 = arith.constant 0 : index
    %c0_4 = arith.constant 0 : index
    %3 = vector.load %arg2[%c0_3, %c0_4] : memref<32x128xbf16, #tpu.memory_space<vmem>>, vector<32x128xbf16>
    %c0_5 = arith.constant 0 : index
    %c0_6 = arith.constant 0 : index
    %4 = vector.load %arg3[%c0_5, %c0_6] : memref<1x128xf32, #tpu.memory_space<vmem>>, vector<1x128xf32>
    %5 = vector.shape_cast %4 : vector<1x128xf32> to vector<1x128xf32>
    %6 = vector.broadcast %5 : vector<1x128xf32> to vector<2x128xf32>
    %c0_7 = arith.constant 0 : index
    %c0_8 = arith.constant 0 : index
    %7 = vector.load %arg4[%c0_7, %c0_8] : memref<64x128xbf16, #tpu.memory_space<vmem>>, vector<64x128xbf16>
    %c0_9 = arith.constant 0 : index
    %c0_10 = arith.constant 0 : index
    %8 = vector.load %arg5[%c0_9, %c0_10] : memref<1x128xf32, #tpu.memory_space<vmem>>, vector<1x128xf32>
    %9 = vector.shape_cast %8 : vector<1x128xf32> to vector<1x128xf32>
    %10 = vector.broadcast %9 : vector<1x128xf32> to vector<2x128xf32>
    %11 = tpu.iota {dimensions = array<i32: 1>} : vector<2x128xi32>
    %c64_i32 = arith.constant 64 : i32
    %12 = vector.broadcast %c64_i32 : i32 to vector<2x128xi32>
    %13 = arith.cmpi sge, %11, %12 : vector<2x128xi32>
    %c96_i32 = arith.constant 96 : i32
    %14 = vector.broadcast %c96_i32 : i32 to vector<2x128xi32>
    %15 = arith.cmpi slt, %11, %14 : vector<2x128xi32>
    %16 = arith.andi %13, %15 : vector<2x128xi1>
    %cst_11 = arith.constant 0.000000e+00 : f32
    %17 = vector.broadcast %cst_11 : f32 to vector<2x32xf32>
    %cst_12 = arith.constant 0.000000e+00 : f32
    %18 = vector.broadcast %cst_12 : f32 to vector<2x32xf32>
    %cst_13 = arith.constant 0.000000e+00 : f32
    %19 = vector.broadcast %cst_13 : f32 to vector<2x32xf32>
    %cst_14 = arith.constant 0.000000e+00 : f32
    %20 = vector.broadcast %cst_14 : f32 to vector<2x32xf32>
    %21 = vector.extract_strided_slice %2 {offsets = [0, 0], sizes = [2, 128], strides = [1, 1]} : vector<16x128xf32> to vector<2x128xf32>
    %22 = arith.truncf %17 : vector<2x32xf32> to vector<2x32xbf16>
    %cst_15 = arith.constant dense<0.000000e+00> : vector<2x128xf32>
    %23 = tpu.matmul %22, %3, %cst_15 {dimension_numbers = #tpu.dot_dimension_numbers<[1], [0], [0], [1], [0, 0, 1, 1], [], []>} : vector<2x32xbf16>, vector<32x128xbf16>, vector<2x128xf32> -> vector<2x128xf32>
    %24 = arith.addf %21, %23 : vector<2x128xf32>
    %25 = arith.addf %24, %6 : vector<2x128xf32>
    %26 = math.tanh %25 : vector<2x128xf32>
    %27 = arith.negf %25 : vector<2x128xf32>
    %28 = math.exp %27 : vector<2x128xf32>
    %cst_16 = arith.constant 1.000000e+00 : f32
    %29 = vector.broadcast %cst_16 : f32 to vector<2x128xf32>
    %30 = arith.addf %29, %28 : vector<2x128xf32>
    %31 = arith.divf %29, %30 : vector<2x128xf32>
    %32 = arith.select %16, %26, %31 : vector<2x128xi1>, vector<2x128xf32>
    %33 = vector.extract_strided_slice %32 {offsets = [0, 0], sizes = [2, 32], strides = [1, 1]} : vector<2x128xf32> to vector<2x32xf32>
    %34 = vector.extract_strided_slice %32 {offsets = [0, 32], sizes = [2, 32], strides = [1, 1]} : vector<2x128xf32> to vector<2x32xf32>
    %35 = vector.extract_strided_slice %32 {offsets = [0, 64], sizes = [2, 32], strides = [1, 1]} : vector<2x128xf32> to vector<2x32xf32>
    %36 = vector.extract_strided_slice %32 {offsets = [0, 96], sizes = [2, 32], strides = [1, 1]} : vector<2x128xf32> to vector<2x32xf32>
    %37 = arith.mulf %34, %19 : vector<2x32xf32>
    %38 = arith.mulf %33, %35 : vector<2x32xf32>
    %39 = arith.addf %37, %38 : vector<2x32xf32>
    %40 = math.tanh %39 : vector<2x32xf32>
    %41 = arith.mulf %36, %40 : vector<2x32xf32>
    %42 = arith.truncf %41 : vector<2x32xf32> to vector<2x32xbf16>
    %43 = arith.truncf %18 : vector<2x32xf32> to vector<2x32xbf16>
    %44 = tpu.concatenate %42, %43 in 1 : vector<2x32xbf16>, vector<2x32xbf16> -> vector<2x64xbf16>
    %cst_17 = arith.constant dense<0.000000e+00> : vector<2x128xf32>
    %45 = tpu.matmul %44, %7, %cst_17 {dimension_numbers = #tpu.dot_dimension_numbers<[1], [0], [0], [1], [0, 0, 1, 1], [], []>} : vector<2x64xbf16>, vector<64x128xbf16>, vector<2x128xf32> -> vector<2x128xf32>
    %46 = arith.addf %45, %10 : vector<2x128xf32>
    %47 = math.tanh %46 : vector<2x128xf32>
    %48 = arith.negf %46 : vector<2x128xf32>
    %49 = math.exp %48 : vector<2x128xf32>
    %cst_18 = arith.constant 1.000000e+00 : f32
    %50 = vector.broadcast %cst_18 : f32 to vector<2x128xf32>
    %51 = arith.addf %50, %49 : vector<2x128xf32>
    %52 = arith.divf %50, %51 : vector<2x128xf32>
    %53 = arith.select %16, %47, %52 : vector<2x128xi1>, vector<2x128xf32>
    %54 = vector.extract_strided_slice %53 {offsets = [0, 0], sizes = [2, 32], strides = [1, 1]} : vector<2x128xf32> to vector<2x32xf32>
    %55 = vector.extract_strided_slice %53 {offsets = [0, 32], sizes = [2, 32], strides = [1, 1]} : vector<2x128xf32> to vector<2x32xf32>
    %56 = vector.extract_strided_slice %53 {offsets = [0, 64], sizes = [2, 32], strides = [1, 1]} : vector<2x128xf32> to vector<2x32xf32>
    %57 = vector.extract_strided_slice %53 {offsets = [0, 96], sizes = [2, 32], strides = [1, 1]} : vector<2x128xf32> to vector<2x32xf32>
    %58 = arith.mulf %55, %20 : vector<2x32xf32>
    %59 = arith.mulf %54, %56 : vector<2x32xf32>
    %60 = arith.addf %58, %59 : vector<2x32xf32>
    %61 = math.tanh %60 : vector<2x32xf32>
    %62 = arith.mulf %57, %61 : vector<2x32xf32>
    %63 = vector.extract_strided_slice %2 {offsets = [2, 0], sizes = [2, 128], strides = [1, 1]} : vector<16x128xf32> to vector<2x128xf32>
    %64 = arith.truncf %41 : vector<2x32xf32> to vector<2x32xbf16>
    %cst_19 = arith.constant dense<0.000000e+00> : vector<2x128xf32>
    %65 = tpu.matmul %64, %3, %cst_19 {dimension_numbers = #tpu.dot_dimension_numbers<[1], [0], [0], [1], [0, 0, 1, 1], [], []>} : vector<2x32xbf16>, vector<32x128xbf16>, vector<2x128xf32> -> vector<2x128xf32>
    %66 = arith.addf %63, %65 : vector<2x128xf32>
    %67 = arith.addf %66, %6 : vector<2x128xf32>
    %68 = math.tanh %67 : vector<2x128xf32>
    %69 = arith.negf %67 : vector<2x128xf32>
    %70 = math.exp %69 : vector<2x128xf32>
    %cst_20 = arith.constant 1.000000e+00 : f32
    %71 = vector.broadcast %cst_20 : f32 to vector<2x128xf32>
    %72 = arith.addf %71, %70 : vector<2x128xf32>
    %73 = arith.divf %71, %72 : vector<2x128xf32>
    %74 = arith.select %16, %68, %73 : vector<2x128xi1>, vector<2x128xf32>
    %75 = vector.extract_strided_slice %74 {offsets = [0, 0], sizes = [2, 32], strides = [1, 1]} : vector<2x128xf32> to vector<2x32xf32>
    %76 = vector.extract_strided_slice %74 {offsets = [0, 32], sizes = [2, 32], strides = [1, 1]} : vector<2x128xf32> to vector<2x32xf32>
    %77 = vector.extract_strided_slice %74 {offsets = [0, 64], sizes = [2, 32], strides = [1, 1]} : vector<2x128xf32> to vector<2x32xf32>
    %78 = vector.extract_strided_slice %74 {offsets = [0, 96], sizes = [2, 32], strides = [1, 1]} : vector<2x128xf32> to vector<2x32xf32>
    %79 = arith.mulf %76, %39 : vector<2x32xf32>
    %80 = arith.mulf %75, %77 : vector<2x32xf32>
    %81 = arith.addf %79, %80 : vector<2x32xf32>
    %82 = math.tanh %81 : vector<2x32xf32>
    %83 = arith.mulf %78, %82 : vector<2x32xf32>
    %84 = arith.truncf %83 : vector<2x32xf32> to vector<2x32xbf16>
    %85 = arith.truncf %62 : vector<2x32xf32> to vector<2x32xbf16>
    %86 = tpu.concatenate %84, %85 in 1 : vector<2x32xbf16>, vector<2x32xbf16> -> vector<2x64xbf16>
    %cst_21 = arith.constant dense<0.000000e+00> : vector<2x128xf32>
    %87 = tpu.matmul %86, %7, %cst_21 {dimension_numbers = #tpu.dot_dimension_numbers<[1], [0], [0], [1], [0, 0, 1, 1], [], []>} : vector<2x64xbf16>, vector<64x128xbf16>, vector<2x128xf32> -> vector<2x128xf32>
    %88 = arith.addf %87, %10 : vector<2x128xf32>
    %89 = math.tanh %88 : vector<2x128xf32>
    %90 = arith.negf %88 : vector<2x128xf32>
    %91 = math.exp %90 : vector<2x128xf32>
    %cst_22 = arith.constant 1.000000e+00 : f32
    %92 = vector.broadcast %cst_22 : f32 to vector<2x128xf32>
    %93 = arith.addf %92, %91 : vector<2x128xf32>
    %94 = arith.divf %92, %93 : vector<2x128xf32>
    %95 = arith.select %16, %89, %94 : vector<2x128xi1>, vector<2x128xf32>
    %96 = vector.extract_strided_slice %95 {offsets = [0, 0], sizes = [2, 32], strides = [1, 1]} : vector<2x128xf32> to vector<2x32xf32>
    %97 = vector.extract_strided_slice %95 {offsets = [0, 32], sizes = [2, 32], strides = [1, 1]} : vector<2x128xf32> to vector<2x32xf32>
    %98 = vector.extract_strided_slice %95 {offsets = [0, 64], sizes = [2, 32], strides = [1, 1]} : vector<2x128xf32> to vector<2x32xf32>
    %99 = vector.extract_strided_slice %95 {offsets = [0, 96], sizes = [2, 32], strides = [1, 1]} : vector<2x128xf32> to vector<2x32xf32>
    %100 = arith.mulf %97, %60 : vector<2x32xf32>
    %101 = arith.mulf %96, %98 : vector<2x32xf32>
    %102 = arith.addf %100, %101 : vector<2x32xf32>
    %103 = math.tanh %102 : vector<2x32xf32>
    %104 = arith.mulf %99, %103 : vector<2x32xf32>
    %105 = vector.extract_strided_slice %2 {offsets = [4, 0], sizes = [2, 128], strides = [1, 1]} : vector<16x128xf32> to vector<2x128xf32>
    %106 = arith.truncf %83 : vector<2x32xf32> to vector<2x32xbf16>
    %cst_23 = arith.constant dense<0.000000e+00> : vector<2x128xf32>
    %107 = tpu.matmul %106, %3, %cst_23 {dimension_numbers = #tpu.dot_dimension_numbers<[1], [0], [0], [1], [0, 0, 1, 1], [], []>} : vector<2x32xbf16>, vector<32x128xbf16>, vector<2x128xf32> -> vector<2x128xf32>
    %108 = arith.addf %105, %107 : vector<2x128xf32>
    %109 = arith.addf %108, %6 : vector<2x128xf32>
    %110 = math.tanh %109 : vector<2x128xf32>
    %111 = arith.negf %109 : vector<2x128xf32>
    %112 = math.exp %111 : vector<2x128xf32>
    %cst_24 = arith.constant 1.000000e+00 : f32
    %113 = vector.broadcast %cst_24 : f32 to vector<2x128xf32>
    %114 = arith.addf %113, %112 : vector<2x128xf32>
    %115 = arith.divf %113, %114 : vector<2x128xf32>
    %116 = arith.select %16, %110, %115 : vector<2x128xi1>, vector<2x128xf32>
    %117 = vector.extract_strided_slice %116 {offsets = [0, 0], sizes = [2, 32], strides = [1, 1]} : vector<2x128xf32> to vector<2x32xf32>
    %118 = vector.extract_strided_slice %116 {offsets = [0, 32], sizes = [2, 32], strides = [1, 1]} : vector<2x128xf32> to vector<2x32xf32>
    %119 = vector.extract_strided_slice %116 {offsets = [0, 64], sizes = [2, 32], strides = [1, 1]} : vector<2x128xf32> to vector<2x32xf32>
    %120 = vector.extract_strided_slice %116 {offsets = [0, 96], sizes = [2, 32], strides = [1, 1]} : vector<2x128xf32> to vector<2x32xf32>
    %121 = arith.mulf %118, %81 : vector<2x32xf32>
    %122 = arith.mulf %117, %119 : vector<2x32xf32>
    %123 = arith.addf %121, %122 : vector<2x32xf32>
    %124 = math.tanh %123 : vector<2x32xf32>
    %125 = arith.mulf %120, %124 : vector<2x32xf32>
    %126 = arith.truncf %125 : vector<2x32xf32> to vector<2x32xbf16>
    %127 = arith.truncf %104 : vector<2x32xf32> to vector<2x32xbf16>
    %128 = tpu.concatenate %126, %127 in 1 : vector<2x32xbf16>, vector<2x32xbf16> -> vector<2x64xbf16>
    %cst_25 = arith.constant dense<0.000000e+00> : vector<2x128xf32>
    %129 = tpu.matmul %128, %7, %cst_25 {dimension_numbers = #tpu.dot_dimension_numbers<[1], [0], [0], [1], [0, 0, 1, 1], [], []>} : vector<2x64xbf16>, vector<64x128xbf16>, vector<2x128xf32> -> vector<2x128xf32>
    %130 = arith.addf %129, %10 : vector<2x128xf32>
    %131 = math.tanh %130 : vector<2x128xf32>
    %132 = arith.negf %130 : vector<2x128xf32>
    %133 = math.exp %132 : vector<2x128xf32>
    %cst_26 = arith.constant 1.000000e+00 : f32
    %134 = vector.broadcast %cst_26 : f32 to vector<2x128xf32>
    %135 = arith.addf %134, %133 : vector<2x128xf32>
    %136 = arith.divf %134, %135 : vector<2x128xf32>
    %137 = arith.select %16, %131, %136 : vector<2x128xi1>, vector<2x128xf32>
    %138 = vector.extract_strided_slice %137 {offsets = [0, 0], sizes = [2, 32], strides = [1, 1]} : vector<2x128xf32> to vector<2x32xf32>
    %139 = vector.extract_strided_slice %137 {offsets = [0, 32], sizes = [2, 32], strides = [1, 1]} : vector<2x128xf32> to vector<2x32xf32>
    %140 = vector.extract_strided_slice %137 {offsets = [0, 64], sizes = [2, 32], strides = [1, 1]} : vector<2x128xf32> to vector<2x32xf32>
    %141 = vector.extract_strided_slice %137 {offsets = [0, 96], sizes = [2, 32], strides = [1, 1]} : vector<2x128xf32> to vector<2x32xf32>
    %142 = arith.mulf %139, %102 : vector<2x32xf32>
    %143 = arith.mulf %138, %140 : vector<2x32xf32>
    %144 = arith.addf %142, %143 : vector<2x32xf32>
    %145 = math.tanh %144 : vector<2x32xf32>
    %146 = arith.mulf %141, %145 : vector<2x32xf32>
    %147 = vector.extract_strided_slice %2 {offsets = [6, 0], sizes = [2, 128], strides = [1, 1]} : vector<16x128xf32> to vector<2x128xf32>
    %148 = arith.truncf %125 : vector<2x32xf32> to vector<2x32xbf16>
    %cst_27 = arith.constant dense<0.000000e+00> : vector<2x128xf32>
    %149 = tpu.matmul %148, %3, %cst_27 {dimension_numbers = #tpu.dot_dimension_numbers<[1], [0], [0], [1], [0, 0, 1, 1], [], []>} : vector<2x32xbf16>, vector<32x128xbf16>, vector<2x128xf32> -> vector<2x128xf32>
    %150 = arith.addf %147, %149 : vector<2x128xf32>
    %151 = arith.addf %150, %6 : vector<2x128xf32>
    %152 = math.tanh %151 : vector<2x128xf32>
    %153 = arith.negf %151 : vector<2x128xf32>
    %154 = math.exp %153 : vector<2x128xf32>
    %cst_28 = arith.constant 1.000000e+00 : f32
    %155 = vector.broadcast %cst_28 : f32 to vector<2x128xf32>
    %156 = arith.addf %155, %154 : vector<2x128xf32>
    %157 = arith.divf %155, %156 : vector<2x128xf32>
    %158 = arith.select %16, %152, %157 : vector<2x128xi1>, vector<2x128xf32>
    %159 = vector.extract_strided_slice %158 {offsets = [0, 0], sizes = [2, 32], strides = [1, 1]} : vector<2x128xf32> to vector<2x32xf32>
    %160 = vector.extract_strided_slice %158 {offsets = [0, 32], sizes = [2, 32], strides = [1, 1]} : vector<2x128xf32> to vector<2x32xf32>
    %161 = vector.extract_strided_slice %158 {offsets = [0, 64], sizes = [2, 32], strides = [1, 1]} : vector<2x128xf32> to vector<2x32xf32>
    %162 = vector.extract_strided_slice %158 {offsets = [0, 96], sizes = [2, 32], strides = [1, 1]} : vector<2x128xf32> to vector<2x32xf32>
    %163 = arith.mulf %160, %123 : vector<2x32xf32>
    %164 = arith.mulf %159, %161 : vector<2x32xf32>
    %165 = arith.addf %163, %164 : vector<2x32xf32>
    %166 = math.tanh %165 : vector<2x32xf32>
    %167 = arith.mulf %162, %166 : vector<2x32xf32>
    %168 = arith.truncf %167 : vector<2x32xf32> to vector<2x32xbf16>
    %169 = arith.truncf %146 : vector<2x32xf32> to vector<2x32xbf16>
    %170 = tpu.concatenate %168, %169 in 1 : vector<2x32xbf16>, vector<2x32xbf16> -> vector<2x64xbf16>
    %cst_29 = arith.constant dense<0.000000e+00> : vector<2x128xf32>
    %171 = tpu.matmul %170, %7, %cst_29 {dimension_numbers = #tpu.dot_dimension_numbers<[1], [0], [0], [1], [0, 0, 1, 1], [], []>} : vector<2x64xbf16>, vector<64x128xbf16>, vector<2x128xf32> -> vector<2x128xf32>
    %172 = arith.addf %171, %10 : vector<2x128xf32>
    %173 = math.tanh %172 : vector<2x128xf32>
    %174 = arith.negf %172 : vector<2x128xf32>
    %175 = math.exp %174 : vector<2x128xf32>
    %cst_30 = arith.constant 1.000000e+00 : f32
    %176 = vector.broadcast %cst_30 : f32 to vector<2x128xf32>
    %177 = arith.addf %176, %175 : vector<2x128xf32>
    %178 = arith.divf %176, %177 : vector<2x128xf32>
    %179 = arith.select %16, %173, %178 : vector<2x128xi1>, vector<2x128xf32>
    %180 = vector.extract_strided_slice %179 {offsets = [0, 0], sizes = [2, 32], strides = [1, 1]} : vector<2x128xf32> to vector<2x32xf32>
    %181 = vector.extract_strided_slice %179 {offsets = [0, 32], sizes = [2, 32], strides = [1, 1]} : vector<2x128xf32> to vector<2x32xf32>
    %182 = vector.extract_strided_slice %179 {offsets = [0, 64], sizes = [2, 32], strides = [1, 1]} : vector<2x128xf32> to vector<2x32xf32>
    %183 = vector.extract_strided_slice %179 {offsets = [0, 96], sizes = [2, 32], strides = [1, 1]} : vector<2x128xf32> to vector<2x32xf32>
    %184 = arith.mulf %181, %144 : vector<2x32xf32>
    %185 = arith.mulf %180, %182 : vector<2x32xf32>
    %186 = arith.addf %184, %185 : vector<2x32xf32>
    %187 = math.tanh %186 : vector<2x32xf32>
    %188 = arith.mulf %183, %187 : vector<2x32xf32>
    %189 = vector.extract_strided_slice %2 {offsets = [8, 0], sizes = [2, 128], strides = [1, 1]} : vector<16x128xf32> to vector<2x128xf32>
    %190 = arith.truncf %167 : vector<2x32xf32> to vector<2x32xbf16>
    %cst_31 = arith.constant dense<0.000000e+00> : vector<2x128xf32>
    %191 = tpu.matmul %190, %3, %cst_31 {dimension_numbers = #tpu.dot_dimension_numbers<[1], [0], [0], [1], [0, 0, 1, 1], [], []>} : vector<2x32xbf16>, vector<32x128xbf16>, vector<2x128xf32> -> vector<2x128xf32>
    %192 = arith.addf %189, %191 : vector<2x128xf32>
    %193 = arith.addf %192, %6 : vector<2x128xf32>
    %194 = math.tanh %193 : vector<2x128xf32>
    %195 = arith.negf %193 : vector<2x128xf32>
    %196 = math.exp %195 : vector<2x128xf32>
    %cst_32 = arith.constant 1.000000e+00 : f32
    %197 = vector.broadcast %cst_32 : f32 to vector<2x128xf32>
    %198 = arith.addf %197, %196 : vector<2x128xf32>
    %199 = arith.divf %197, %198 : vector<2x128xf32>
    %200 = arith.select %16, %194, %199 : vector<2x128xi1>, vector<2x128xf32>
    %201 = vector.extract_strided_slice %200 {offsets = [0, 0], sizes = [2, 32], strides = [1, 1]} : vector<2x128xf32> to vector<2x32xf32>
    %202 = vector.extract_strided_slice %200 {offsets = [0, 32], sizes = [2, 32], strides = [1, 1]} : vector<2x128xf32> to vector<2x32xf32>
    %203 = vector.extract_strided_slice %200 {offsets = [0, 64], sizes = [2, 32], strides = [1, 1]} : vector<2x128xf32> to vector<2x32xf32>
    %204 = vector.extract_strided_slice %200 {offsets = [0, 96], sizes = [2, 32], strides = [1, 1]} : vector<2x128xf32> to vector<2x32xf32>
    %205 = arith.mulf %202, %165 : vector<2x32xf32>
    %206 = arith.mulf %201, %203 : vector<2x32xf32>
    %207 = arith.addf %205, %206 : vector<2x32xf32>
    %208 = math.tanh %207 : vector<2x32xf32>
    %209 = arith.mulf %204, %208 : vector<2x32xf32>
    %210 = arith.truncf %209 : vector<2x32xf32> to vector<2x32xbf16>
    %211 = arith.truncf %188 : vector<2x32xf32> to vector<2x32xbf16>
    %212 = tpu.concatenate %210, %211 in 1 : vector<2x32xbf16>, vector<2x32xbf16> -> vector<2x64xbf16>
    %cst_33 = arith.constant dense<0.000000e+00> : vector<2x128xf32>
    %213 = tpu.matmul %212, %7, %cst_33 {dimension_numbers = #tpu.dot_dimension_numbers<[1], [0], [0], [1], [0, 0, 1, 1], [], []>} : vector<2x64xbf16>, vector<64x128xbf16>, vector<2x128xf32> -> vector<2x128xf32>
    %214 = arith.addf %213, %10 : vector<2x128xf32>
    %215 = math.tanh %214 : vector<2x128xf32>
    %216 = arith.negf %214 : vector<2x128xf32>
    %217 = math.exp %216 : vector<2x128xf32>
    %cst_34 = arith.constant 1.000000e+00 : f32
    %218 = vector.broadcast %cst_34 : f32 to vector<2x128xf32>
    %219 = arith.addf %218, %217 : vector<2x128xf32>
    %220 = arith.divf %218, %219 : vector<2x128xf32>
    %221 = arith.select %16, %215, %220 : vector<2x128xi1>, vector<2x128xf32>
    %222 = vector.extract_strided_slice %221 {offsets = [0, 0], sizes = [2, 32], strides = [1, 1]} : vector<2x128xf32> to vector<2x32xf32>
    %223 = vector.extract_strided_slice %221 {offsets = [0, 32], sizes = [2, 32], strides = [1, 1]} : vector<2x128xf32> to vector<2x32xf32>
    %224 = vector.extract_strided_slice %221 {offsets = [0, 64], sizes = [2, 32], strides = [1, 1]} : vector<2x128xf32> to vector<2x32xf32>
    %225 = vector.extract_strided_slice %221 {offsets = [0, 96], sizes = [2, 32], strides = [1, 1]} : vector<2x128xf32> to vector<2x32xf32>
    %226 = arith.mulf %223, %186 : vector<2x32xf32>
    %227 = arith.mulf %222, %224 : vector<2x32xf32>
    %228 = arith.addf %226, %227 : vector<2x32xf32>
    %229 = math.tanh %228 : vector<2x32xf32>
    %230 = arith.mulf %225, %229 : vector<2x32xf32>
    %231 = vector.extract_strided_slice %2 {offsets = [10, 0], sizes = [2, 128], strides = [1, 1]} : vector<16x128xf32> to vector<2x128xf32>
    %232 = arith.truncf %209 : vector<2x32xf32> to vector<2x32xbf16>
    %cst_35 = arith.constant dense<0.000000e+00> : vector<2x128xf32>
    %233 = tpu.matmul %232, %3, %cst_35 {dimension_numbers = #tpu.dot_dimension_numbers<[1], [0], [0], [1], [0, 0, 1, 1], [], []>} : vector<2x32xbf16>, vector<32x128xbf16>, vector<2x128xf32> -> vector<2x128xf32>
    %234 = arith.addf %231, %233 : vector<2x128xf32>
    %235 = arith.addf %234, %6 : vector<2x128xf32>
    %236 = math.tanh %235 : vector<2x128xf32>
    %237 = arith.negf %235 : vector<2x128xf32>
    %238 = math.exp %237 : vector<2x128xf32>
    %cst_36 = arith.constant 1.000000e+00 : f32
    %239 = vector.broadcast %cst_36 : f32 to vector<2x128xf32>
    %240 = arith.addf %239, %238 : vector<2x128xf32>
    %241 = arith.divf %239, %240 : vector<2x128xf32>
    %242 = arith.select %16, %236, %241 : vector<2x128xi1>, vector<2x128xf32>
    %243 = vector.extract_strided_slice %242 {offsets = [0, 0], sizes = [2, 32], strides = [1, 1]} : vector<2x128xf32> to vector<2x32xf32>
    %244 = vector.extract_strided_slice %242 {offsets = [0, 32], sizes = [2, 32], strides = [1, 1]} : vector<2x128xf32> to vector<2x32xf32>
    %245 = vector.extract_strided_slice %242 {offsets = [0, 64], sizes = [2, 32], strides = [1, 1]} : vector<2x128xf32> to vector<2x32xf32>
    %246 = vector.extract_strided_slice %242 {offsets = [0, 96], sizes = [2, 32], strides = [1, 1]} : vector<2x128xf32> to vector<2x32xf32>
    %247 = arith.mulf %244, %207 : vector<2x32xf32>
    %248 = arith.mulf %243, %245 : vector<2x32xf32>
    %249 = arith.addf %247, %248 : vector<2x32xf32>
    %250 = math.tanh %249 : vector<2x32xf32>
    %251 = arith.mulf %246, %250 : vector<2x32xf32>
    %252 = arith.truncf %251 : vector<2x32xf32> to vector<2x32xbf16>
    %253 = arith.truncf %230 : vector<2x32xf32> to vector<2x32xbf16>
    %254 = tpu.concatenate %252, %253 in 1 : vector<2x32xbf16>, vector<2x32xbf16> -> vector<2x64xbf16>
    %cst_37 = arith.constant dense<0.000000e+00> : vector<2x128xf32>
    %255 = tpu.matmul %254, %7, %cst_37 {dimension_numbers = #tpu.dot_dimension_numbers<[1], [0], [0], [1], [0, 0, 1, 1], [], []>} : vector<2x64xbf16>, vector<64x128xbf16>, vector<2x128xf32> -> vector<2x128xf32>
    %256 = arith.addf %255, %10 : vector<2x128xf32>
    %257 = math.tanh %256 : vector<2x128xf32>
    %258 = arith.negf %256 : vector<2x128xf32>
    %259 = math.exp %258 : vector<2x128xf32>
    %cst_38 = arith.constant 1.000000e+00 : f32
    %260 = vector.broadcast %cst_38 : f32 to vector<2x128xf32>
    %261 = arith.addf %260, %259 : vector<2x128xf32>
    %262 = arith.divf %260, %261 : vector<2x128xf32>
    %263 = arith.select %16, %257, %262 : vector<2x128xi1>, vector<2x128xf32>
    %264 = vector.extract_strided_slice %263 {offsets = [0, 0], sizes = [2, 32], strides = [1, 1]} : vector<2x128xf32> to vector<2x32xf32>
    %265 = vector.extract_strided_slice %263 {offsets = [0, 32], sizes = [2, 32], strides = [1, 1]} : vector<2x128xf32> to vector<2x32xf32>
    %266 = vector.extract_strided_slice %263 {offsets = [0, 64], sizes = [2, 32], strides = [1, 1]} : vector<2x128xf32> to vector<2x32xf32>
    %267 = vector.extract_strided_slice %263 {offsets = [0, 96], sizes = [2, 32], strides = [1, 1]} : vector<2x128xf32> to vector<2x32xf32>
    %268 = arith.mulf %265, %228 : vector<2x32xf32>
    %269 = arith.mulf %264, %266 : vector<2x32xf32>
    %270 = arith.addf %268, %269 : vector<2x32xf32>
    %271 = math.tanh %270 : vector<2x32xf32>
    %272 = arith.mulf %267, %271 : vector<2x32xf32>
    %273 = vector.extract_strided_slice %2 {offsets = [12, 0], sizes = [2, 128], strides = [1, 1]} : vector<16x128xf32> to vector<2x128xf32>
    %274 = arith.truncf %251 : vector<2x32xf32> to vector<2x32xbf16>
    %cst_39 = arith.constant dense<0.000000e+00> : vector<2x128xf32>
    %275 = tpu.matmul %274, %3, %cst_39 {dimension_numbers = #tpu.dot_dimension_numbers<[1], [0], [0], [1], [0, 0, 1, 1], [], []>} : vector<2x32xbf16>, vector<32x128xbf16>, vector<2x128xf32> -> vector<2x128xf32>
    %276 = arith.addf %273, %275 : vector<2x128xf32>
    %277 = arith.addf %276, %6 : vector<2x128xf32>
    %278 = math.tanh %277 : vector<2x128xf32>
    %279 = arith.negf %277 : vector<2x128xf32>
    %280 = math.exp %279 : vector<2x128xf32>
    %cst_40 = arith.constant 1.000000e+00 : f32
    %281 = vector.broadcast %cst_40 : f32 to vector<2x128xf32>
    %282 = arith.addf %281, %280 : vector<2x128xf32>
    %283 = arith.divf %281, %282 : vector<2x128xf32>
    %284 = arith.select %16, %278, %283 : vector<2x128xi1>, vector<2x128xf32>
    %285 = vector.extract_strided_slice %284 {offsets = [0, 0], sizes = [2, 32], strides = [1, 1]} : vector<2x128xf32> to vector<2x32xf32>
    %286 = vector.extract_strided_slice %284 {offsets = [0, 32], sizes = [2, 32], strides = [1, 1]} : vector<2x128xf32> to vector<2x32xf32>
    %287 = vector.extract_strided_slice %284 {offsets = [0, 64], sizes = [2, 32], strides = [1, 1]} : vector<2x128xf32> to vector<2x32xf32>
    %288 = vector.extract_strided_slice %284 {offsets = [0, 96], sizes = [2, 32], strides = [1, 1]} : vector<2x128xf32> to vector<2x32xf32>
    %289 = arith.mulf %286, %249 : vector<2x32xf32>
    %290 = arith.mulf %285, %287 : vector<2x32xf32>
    %291 = arith.addf %289, %290 : vector<2x32xf32>
    %292 = math.tanh %291 : vector<2x32xf32>
    %293 = arith.mulf %288, %292 : vector<2x32xf32>
    %294 = arith.truncf %293 : vector<2x32xf32> to vector<2x32xbf16>
    %295 = arith.truncf %272 : vector<2x32xf32> to vector<2x32xbf16>
    %296 = tpu.concatenate %294, %295 in 1 : vector<2x32xbf16>, vector<2x32xbf16> -> vector<2x64xbf16>
    %cst_41 = arith.constant dense<0.000000e+00> : vector<2x128xf32>
    %297 = tpu.matmul %296, %7, %cst_41 {dimension_numbers = #tpu.dot_dimension_numbers<[1], [0], [0], [1], [0, 0, 1, 1], [], []>} : vector<2x64xbf16>, vector<64x128xbf16>, vector<2x128xf32> -> vector<2x128xf32>
    %298 = arith.addf %297, %10 : vector<2x128xf32>
    %299 = math.tanh %298 : vector<2x128xf32>
    %300 = arith.negf %298 : vector<2x128xf32>
    %301 = math.exp %300 : vector<2x128xf32>
    %cst_42 = arith.constant 1.000000e+00 : f32
    %302 = vector.broadcast %cst_42 : f32 to vector<2x128xf32>
    %303 = arith.addf %302, %301 : vector<2x128xf32>
    %304 = arith.divf %302, %303 : vector<2x128xf32>
    %305 = arith.select %16, %299, %304 : vector<2x128xi1>, vector<2x128xf32>
    %306 = vector.extract_strided_slice %305 {offsets = [0, 0], sizes = [2, 32], strides = [1, 1]} : vector<2x128xf32> to vector<2x32xf32>
    %307 = vector.extract_strided_slice %305 {offsets = [0, 32], sizes = [2, 32], strides = [1, 1]} : vector<2x128xf32> to vector<2x32xf32>
    %308 = vector.extract_strided_slice %305 {offsets = [0, 64], sizes = [2, 32], strides = [1, 1]} : vector<2x128xf32> to vector<2x32xf32>
    %309 = vector.extract_strided_slice %305 {offsets = [0, 96], sizes = [2, 32], strides = [1, 1]} : vector<2x128xf32> to vector<2x32xf32>
    %310 = arith.mulf %307, %270 : vector<2x32xf32>
    %311 = arith.mulf %306, %308 : vector<2x32xf32>
    %312 = arith.addf %310, %311 : vector<2x32xf32>
    %313 = math.tanh %312 : vector<2x32xf32>
    %314 = arith.mulf %309, %313 : vector<2x32xf32>
    %315 = vector.extract_strided_slice %2 {offsets = [14, 0], sizes = [2, 128], strides = [1, 1]} : vector<16x128xf32> to vector<2x128xf32>
    %316 = arith.truncf %293 : vector<2x32xf32> to vector<2x32xbf16>
    %cst_43 = arith.constant dense<0.000000e+00> : vector<2x128xf32>
    %317 = tpu.matmul %316, %3, %cst_43 {dimension_numbers = #tpu.dot_dimension_numbers<[1], [0], [0], [1], [0, 0, 1, 1], [], []>} : vector<2x32xbf16>, vector<32x128xbf16>, vector<2x128xf32> -> vector<2x128xf32>
    %318 = arith.addf %315, %317 : vector<2x128xf32>
    %319 = arith.addf %318, %6 : vector<2x128xf32>
    %320 = math.tanh %319 : vector<2x128xf32>
    %321 = arith.negf %319 : vector<2x128xf32>
    %322 = math.exp %321 : vector<2x128xf32>
    %cst_44 = arith.constant 1.000000e+00 : f32
    %323 = vector.broadcast %cst_44 : f32 to vector<2x128xf32>
    %324 = arith.addf %323, %322 : vector<2x128xf32>
    %325 = arith.divf %323, %324 : vector<2x128xf32>
    %326 = arith.select %16, %320, %325 : vector<2x128xi1>, vector<2x128xf32>
    %327 = vector.extract_strided_slice %326 {offsets = [0, 0], sizes = [2, 32], strides = [1, 1]} : vector<2x128xf32> to vector<2x32xf32>
    %328 = vector.extract_strided_slice %326 {offsets = [0, 32], sizes = [2, 32], strides = [1, 1]} : vector<2x128xf32> to vector<2x32xf32>
    %329 = vector.extract_strided_slice %326 {offsets = [0, 64], sizes = [2, 32], strides = [1, 1]} : vector<2x128xf32> to vector<2x32xf32>
    %330 = vector.extract_strided_slice %326 {offsets = [0, 96], sizes = [2, 32], strides = [1, 1]} : vector<2x128xf32> to vector<2x32xf32>
    %331 = arith.mulf %328, %291 : vector<2x32xf32>
    %332 = arith.mulf %327, %329 : vector<2x32xf32>
    %333 = arith.addf %331, %332 : vector<2x32xf32>
    %334 = math.tanh %333 : vector<2x32xf32>
    %335 = arith.mulf %330, %334 : vector<2x32xf32>
    %336 = arith.truncf %335 : vector<2x32xf32> to vector<2x32xbf16>
    %337 = arith.truncf %314 : vector<2x32xf32> to vector<2x32xbf16>
    %338 = tpu.concatenate %336, %337 in 1 : vector<2x32xbf16>, vector<2x32xbf16> -> vector<2x64xbf16>
    %cst_45 = arith.constant dense<0.000000e+00> : vector<2x128xf32>
    %339 = tpu.matmul %338, %7, %cst_45 {dimension_numbers = #tpu.dot_dimension_numbers<[1], [0], [0], [1], [0, 0, 1, 1], [], []>} : vector<2x64xbf16>, vector<64x128xbf16>, vector<2x128xf32> -> vector<2x128xf32>
    %340 = arith.addf %339, %10 : vector<2x128xf32>
    %341 = math.tanh %340 : vector<2x128xf32>
    %342 = arith.negf %340 : vector<2x128xf32>
    %343 = math.exp %342 : vector<2x128xf32>
    %cst_46 = arith.constant 1.000000e+00 : f32
    %344 = vector.broadcast %cst_46 : f32 to vector<2x128xf32>
    %345 = arith.addf %344, %343 : vector<2x128xf32>
    %346 = arith.divf %344, %345 : vector<2x128xf32>
    %347 = arith.select %16, %341, %346 : vector<2x128xi1>, vector<2x128xf32>
    %348 = vector.extract_strided_slice %347 {offsets = [0, 0], sizes = [2, 32], strides = [1, 1]} : vector<2x128xf32> to vector<2x32xf32>
    %349 = vector.extract_strided_slice %347 {offsets = [0, 32], sizes = [2, 32], strides = [1, 1]} : vector<2x128xf32> to vector<2x32xf32>
    %350 = vector.extract_strided_slice %347 {offsets = [0, 64], sizes = [2, 32], strides = [1, 1]} : vector<2x128xf32> to vector<2x32xf32>
    %351 = vector.extract_strided_slice %347 {offsets = [0, 96], sizes = [2, 32], strides = [1, 1]} : vector<2x128xf32> to vector<2x32xf32>
    %352 = arith.mulf %349, %312 : vector<2x32xf32>
    %353 = arith.mulf %348, %350 : vector<2x32xf32>
    %354 = arith.addf %352, %353 : vector<2x32xf32>
    %355 = math.tanh %354 : vector<2x32xf32>
    %356 = arith.mulf %351, %355 : vector<2x32xf32>
    %357 = arith.truncf %356 : vector<2x32xf32> to vector<2x32xbf16>
    %c0_47 = arith.constant 0 : index
    %c0_48 = arith.constant 0 : index
    %358 = vector.load %arg6[%c0_47, %c0_48] : memref<32x128xbf16, #tpu.memory_space<vmem>>, vector<32x128xbf16>
    %cst_49 = arith.constant dense<0.000000e+00> : vector<2x128xf32>
    %359 = tpu.matmul %357, %358, %cst_49 {dimension_numbers = #tpu.dot_dimension_numbers<[1], [0], [0], [1], [0, 0, 1, 1], [], []>} : vector<2x32xbf16>, vector<32x128xbf16>, vector<2x128xf32> -> vector<2x128xf32>
    %c0_50 = arith.constant 0 : index
    %c0_51 = arith.constant 0 : index
    %360 = vector.load %arg7[%c0_50, %c0_51] : memref<1x128xf32, #tpu.memory_space<vmem>>, vector<1x128xf32>
    %361 = vector.broadcast %360 : vector<1x128xf32> to vector<2x128xf32>
    %362 = arith.addf %359, %361 : vector<2x128xf32>
    %c0_52 = arith.constant 0 : index
    %c0_53 = arith.constant 0 : index
    %363 = vector.load %arg8[%c0_52, %c0_53] : memref<2x128xf32, #tpu.memory_space<vmem>>, vector<2x128xf32>
    tpu.vector_store %arg8[%c0_52, %c0_53], %362 {strides = array<i32>} : memref<2x128xf32, #tpu.memory_space<vmem>>, vector<2x128xf32>,
    return
  }
}

</mosaic_0001>

<bundles_post_ra>
// kernel: tpu_custom_call.1
= control target key start
LH: loop header
LB: loop body
LE: loop exit
PB: predicated region body
PF: predicated region fallthrough
CT: control target
= control target key end

     0   :  { %13 = vsyncpa [#allocation3], 0  ;;  %s2637_s0 = inlined_call_operand.hbm [shape: bf16[16,16], index: 0, kind: input, shape index: {}]   ;;  %s2638_s1 = inlined_call_operand.hbm [shape: bf16[16,128], index: 1, kind: input, shape index: {}]   ;;  %s2639_s2 = inlined_call_operand.hbm [shape: bf16[32,128], index: 2, kind: input, shape index: {}]   ;;  %s2640_s3 = inlined_call_operand.vmem [shape: f32[1,128], index: 3, kind: input, shape index: {}]   ;;  %s2641_s4 = inlined_call_operand.hbm [shape: bf16[64,128], index: 4, kind: input, shape index: {}]   ;;  %s2642_s5 = inlined_call_operand.vmem [shape: f32[1,128], index: 5, kind: input, shape index: {}]   ;;  %s2643_s6 = inlined_call_operand.vmem [shape: bf16[32,128], index: 6, kind: input, shape index: {}]   ;;  %s2644_s7 = inlined_call_operand.vmem [shape: f32[1,128], index: 7, kind: input, shape index: {}]   ;;  %s2645_s8 = inlined_call_operand.hbm [shape: f32[2,128], index: 8, kind: output, shape index: {}]  }
   0x1   :  { %14 = vsyncpa [#allocation6], 0 }
   0x2   :  { %15 = vsyncpa [#allocation9], 0 }
   0x3   :  { %16 = vsyncpa [#allocation4], 0  ;;  %s2120_s27 = smov [#allocation5]   ;;  %s2121_s29 = smov [#allocation2]  }
   0x4   :  { %s34_s28 = sshll.u32 %s2120_s27, 4  ;;  %s22_s30 = sshll.u32 %s2121_s29, 4  ;;  %s35_s28 = int_to_ptr.vmem [resolvable:$true] %s34_s28  ;;  %s2176_s30 = int_to_ptr.vmem [resolvable:$true] %s22_s30 }
   0x5   :  { %s2002_s11 = scalar_lea.hbm %s2638_s1, 128 }
   0x6   :  { %p2003_p0 = scmp.ne.s32.totalorder %s2638_s1, %s2002_s11  ;;  %p2006_p1 = scmp.lt.u32.totalorder %s2002_s11, %s2638_s1 }
   0x8   :  { %p2008_p2 = pnand %p2006_p1, %p2003_p0 }
   0xa   :  { %2011 = shalt.err (!%p2008_p2)
}
   0xb   :  { %s2012_s16 = scalar_lea.vmem %s35_s28, 128  ;;  %p2017_p4 = scmp.lt.s32.totalorder %s35_s28, %s35_s28 }
   0xc   :  { %p2013_p3 = scmp.ne.s32.totalorder %s35_s28, %s2012_s16  ;;  %p2018_p5 = scmp.lt.s32.totalorder %s2012_s16, %s2012_s16 }
   0xe   :  { %p2019_p6 = por %p2018_p5, %p2017_p4 }
  0x10   :  { %p2020_p7 = pnand %p2019_p6, %p2013_p3 }
  0x12   :  { %2023 = shalt.err (!%p2020_p7)
}
  0x13   :  { %s2122_s17 = smov 64   ;;  %s2123_s18 = smov 4  }
  0x14   :  { %40 = dma.hbm_to_vmem [thread:$0]  %s2638_s1, 128, %s35_s28, [#allocation6], %s2122_s17, %s2122_s17, %s2123_s18  }
  0x15   :  { %s2024_s23 = scalar_lea.hbm %s2637_s0, 128 }
  0x16   :  { %p2025_p8 = scmp.ne.s32.totalorder %s2637_s0, %s2024_s23  ;;  %p2028_p9 = scmp.lt.u32.totalorder %s2024_s23, %s2637_s0 }
  0x18   :  { %p2030_p10 = pnand %p2028_p9, %p2025_p8 }
  0x1a   :  { %2033 = shalt.err (!%p2030_p10)
}
  0x1b   :  { %s2034_s29 = scalar_lea.vmem %s2176_s30, 128  ;;  %p2039_p12 = scmp.lt.s32.totalorder %s2176_s30, %s2176_s30 }
  0x1c   :  { %p2035_p11 = scmp.ne.s32.totalorder %s2176_s30, %s2034_s29  ;;  %p2040_p13 = scmp.lt.s32.totalorder %s2034_s29, %s2034_s29 }
  0x1e   :  { %p2041_p0 = por %p2040_p13, %p2039_p12 }
  0x20   :  { %p2042_p1 = pnand %p2041_p0, %p2035_p11 }
  0x22   :  { %2045 = shalt.err (!%p2042_p1)
}
  0x23   :  { %28 = dma.hbm_to_vmem [thread:$0]  %s2637_s0, 128, %s2176_s30, [#allocation3], %s2122_s17, %s2122_s17, %s2123_s18  }
  0x24   :  { %s2124_s9 = smov [#allocation7]   ;;  %s2125_s11 = smov [#allocation8]  }
  0x25   :  { %s46_s10 = sshll.u32 %s2124_s9, 4  ;;  %s60_s12 = sshll.u32 %s2125_s11, 4  ;;  %s47_s10 = int_to_ptr.vmem [resolvable:$true] %s46_s10  ;;  %s2213_s12 = int_to_ptr.vmem [resolvable:$true] %s60_s12 }
  0x26   :  { %s2046_s15 = scalar_lea.hbm %s2639_s2, 256 }
  0x27   :  { %p2047_p2 = scmp.ne.s32.totalorder %s2639_s2, %s2046_s15  ;;  %p2050_p3 = scmp.lt.u32.totalorder %s2046_s15, %s2639_s2 }
  0x29   :  { %p2052_p4 = pnand %p2050_p3, %p2047_p2 }
  0x2b   :  { %2055 = shalt.err (!%p2052_p4)
}
  0x2c   :  { %s2056_s0 = scalar_lea.vmem %s47_s10, 256  ;;  %p2061_p6 = scmp.lt.s32.totalorder %s47_s10, %s47_s10 }
  0x2d   :  { %p2057_p5 = scmp.ne.s32.totalorder %s47_s10, %s2056_s0  ;;  %p2062_p7 = scmp.lt.s32.totalorder %s2056_s0, %s2056_s0 }
  0x2f   :  { %p2063_p8 = por %p2062_p7, %p2061_p6 }
  0x31   :  { %p2064_p9 = pnand %p2063_p8, %p2057_p5 }
  0x33   :  { %2067 = shalt.err (!%p2064_p9)
}
  0x34   :  { %52 = dma.hbm_to_vmem [thread:$0]  %s2639_s2, 256, %s47_s10, [#allocation6], %s2122_s17, %s2122_s17, %s2123_s18  }
  0x35   :  { %s2068_s25 = scalar_lea.hbm %s2641_s4, 512 }
  0x36   :  { %p2069_p10 = scmp.ne.s32.totalorder %s2641_s4, %s2068_s25  ;;  %p2072_p11 = scmp.lt.u32.totalorder %s2068_s25, %s2641_s4 }
  0x38   :  { %p2074_p12 = pnand %p2072_p11, %p2069_p10 }
  0x3a   :  { %2077 = shalt.err (!%p2074_p12)
}
  0x3b   :  { %s2078_s28 = scalar_lea.vmem %s2213_s12, 512  ;;  %p2083_p0 = scmp.lt.s32.totalorder %s2213_s12, %s2213_s12 }
  0x3c   :  { %p2079_p13 = scmp.ne.s32.totalorder %s2213_s12, %s2078_s28  ;;  %p2084_p1 = scmp.lt.s32.totalorder %s2078_s28, %s2078_s28 }
  0x3e   :  { %p2085_p2 = por %p2084_p1, %p2083_p0 }
  0x40   :  { %p2086_p3 = pnand %p2085_p2, %p2079_p13 }
  0x42   :  { %2089 = shalt.err (!%p2086_p3)
}
  0x43   :  { %66 = dma.hbm_to_vmem [thread:$0]  %s2641_s4, 512, %s2213_s12, [#allocation9], %s2122_s17, %s2122_s17, %s2123_s18  }
  0x44   :  { %2112 = dma.done.wait [#allocation3], 128  }
  0x45   :  { %2113 = vsyncadd [#allocation3], 4294967168 }
  0x46   :  { %2114 = dma.done.wait [#allocation6], 384  }
  0x47   :  { %2115 = vsyncadd [#allocation6], 4294966912 }
  0x48   :  { %2116 = dma.done.wait [#allocation9], 512  }
  0x49   :  { %2117 = vsyncadd [#allocation9], 4294966784  ;;  %v2126_v0 = vmov 0.0   ;;  %vm2127_vm0 = vmmov 0   ;;  %v2256_v1 = vld [vmem:[#allocation7] sm:$0xff]   ;;  %v1859_v2 = vld [vmem:[#allocation5] sm:$0xff]   ;;  %v172_v19 = vlaneseq }
  0x4a   :  { %1679 = vmatprep.subr.bf16.mxu1 %v2126_v0  ;;  %1673 = vmatprep.subr.bf16.mxu0 %v2126_v0  ;;  %v1860_v3 = vld [vmem:[#allocation2] sm:$0xff]   ;;  %vm101_vm1 = vcmask 130048   ;;  %v2260_v4 = vld [vmem:[#allocation7 + $0x8] sm:$0xff]   ;;  %v2128_v5 = vmov 0   ;;  %v2280_v10 = vld [vmem:[%s2640_s3] ss:$0 sm:$0xff] }
  0x4b   :  { %1675 = vmatprep.mubr.msk.bf16.mxu0 %vm2127_vm0, %v2126_v0  ;;  %1683 = vmatprep.mubr.msk.bf16.mxu1 %vm2127_vm0, %v2126_v0  ;;  %v173_v21 = vand.u32 127, %v172_v19  ;;  %s2129_s10 = smov 32   ;;  %v2295_v31 = vld [vmem:[#allocation8] sm:$0xff]   ;;  %v2298_v32 = vld [vmem:[#allocation8 + $0x8] sm:$0xff]   ;;  %v2302_v33 = vld [vmem:[#allocation8 + $0x10] sm:$0xff]   ;;  %vm189_vm5 = vcmask 261120  }
  0x4c   :  { %1680 = vmatpush3.bf16.msra.mxu1 %v2256_v1  ;;  %1674 = vmatpush3.bf16.msra.mxu0 %v1859_v2  ;;  %v2307_v35 = vld [vmem:[#allocation8 + $0x18] sm:$0xff]   ;;  %vm290_vm6 = vcmask 523264   ;;  %v2335_v41 = vld [vmem:[%s2642_s5] ss:$0 sm:$0xff]  ;;  %s2130_s30 = smov [#allocation10]  }
  0x4d   :  { %1681 = vmatprep.subr.bf16.mxu1 %v2126_v0  ;;  %1687 = vmatprep.subr.bf16.mxu0 %v2126_v0  ;;  %vm174_vm2 = vcmp.ge.s32.totalorder %v173_v21, 64  ;;  %vm175_vm3 = vcmp.lt.s32.totalorder %v173_v21, 96  ;;  %v1867_v22 = vld [vmem:[%s2643_s6 + $0x8] sm:$0xff]  }
  0x4e   :  { %vm2284_vm4 = vmand %vm174_vm2, %vm175_vm3 }
  0x4f   :  { %1676 = vmatmul.mubr.msk.bf16.vlgmr.msra.gmra.mrb[0].mxu0 %vm101_vm1, %v1860_v3 }
  0x50   :  { %1682 = vmatpush3.bf16.msra.mxu1 %v2260_v4  ;;  %1695 = vmatprep.mubr.msk.bf16.mxu0 %vm2127_vm0, %v2126_v0 }
  0x51   :  { %1699 = vmatprep.subr.bf16.mxu1 %v2126_v0  ;;  %1688 = vmatpush3.bf16.msra.mxu0 %v2295_v31 }
  0x52   :  { %1689 = vmatprep.subr.bf16.mxu0 %v2126_v0 }
  0x53   :  { %1684 = vmatmul.mubr.bf16.vlgmr.msra.gmra.mrb[0].mxu1 %v2128_v5 }
  0x54   :  { %1700 = vmatpush3.bf16.msra.mxu1 %v2256_v1  ;;  %1703 = vmatprep.mubr.msk.bf16.mxu1 %vm2127_vm0, %v2126_v0 }
  0x55   :  { %1701 = vmatprep.subr.bf16.mxu1 %v2126_v0  ;;  %1690 = vmatpush3.bf16.msra.mxu0 %v2298_v32 }
  0x56   :  { %1691 = vmatprep.subr.bf16.mxu0 %v2126_v0 }
  0x58   :  { %1702 = vmatpush3.bf16.msra.mxu1 %v2260_v4 }
  0x59   :  { %1707 = vmatprep.subr.bf16.mxu1 %v2126_v0  ;;  %1692 = vmatpush3.bf16.msra.mxu0 %v2302_v33 }
  0x5a   :  { %1693 = vmatprep.subr.bf16.mxu0 %v2126_v0 }
  0x5d   :  { %1694 = vmatpush3.bf16.msra.mxu0 %v2307_v35 }
  0x5e   :  { %1719 = vmatprep.subr.bf16.mxu0 %v2126_v0 }
 0x122   :  { %v2273_v6 = vpop.f32.mrb[0].mxu0 }
 0x123   :  { %v1677_v7 = vpop.f32.mrb[1].mxu0 }
 0x124   :  { %v2275_v8 = vpop.f32.mrb[2].mxu0 }
 0x125   :  { %v1678_v9 = vpop.f32.mrb[3].mxu0 }
 0x126   :  { %v227_v11 = vpop.f32.mrb[0].mxu1 }
 0x127   :  { %v233_v12 = vadd.f32 %v227_v11, %v2273_v6  ;;  %v1685_v13 = vpop.f32.mrb[1].mxu1 }
 0x128   :  { %v230_v14 = vpop.f32.mrb[2].mxu1 }
 0x129   :  { %v234_v15 = vadd.f32 %v2280_v10, %v233_v12  ;;  %v1686_v16 = vpop.f32.mrb[3].mxu1 }
 0x12b   :  { %v1565_v17 = vmul.f32 -1.442695, %v234_v15 }
 0x12d   :  { %1868 = vpow2.f32 %v1565_v17 }
 0x12e   :  { %1870 = vtanh.f32 %v234_v15 }
 0x137   :  { %v1869_v18 = vpop.eup %1868 }
 0x138   :  { %v239_v20 = vadd.f32 1.0, %v1869_v18  ;;  %v1871_v23 = vpop.eup %1870 }
 0x13a   :  { %1872 = vrcp.f32 %v239_v20 }
 0x144   :  { %v1873_v24 = vpop.eup %1872 }
 0x145   :  { %v242_v25 = vsel %vm2284_vm4, %v1871_v23, %v1873_v24 }
 0x146   :  { %245 = vrot.lane.b32.xlu0 %v242_v25, %s2122_s17  ;;  %v243_v28 = vmul.f32 0.0, %v242_v25 }
 0x1b8   :  { %v246_v26 = vpop.permute.xlu0 %245 }
 0x1b9   :  { %v248_v27 = vmul.f32 %v246_v26, %v242_v25 }
 0x1bb   :  { %250 = vrot.lane.b32.xlu0 %v248_v27, %s2129_s10 }
 0x22d   :  { %v251_v29 = vpop.permute.xlu0 %250 }
 0x22e   :  { %v2292_v30 = vadd.f32 %v251_v29, %v243_v28 }
 0x230   :  { %1874 = vtanh.f32 %v2292_v30  ;;  %v414_v13 = vrot.slane %v2292_v30, 6 }
 0x23a   :  { %v1875_v34 = vpop.eup %1874 }
 0x23b   :  { %256 = vrot.lane.b32.xlu1 %v1875_v34, %s2122_s17 }
 0x2ad   :  { %v257_v36 = vpop.permute.xlu1 %256 }
 0x2ae   :  { %v259_v37 = vmul.f32 %v257_v36, %v242_v25 }
 0x2b0   :  { %v260_v38 = vpack.c.bf16 %v259_v37, %v259_v37 }
 0x2b2   :  { %262 = vrot.lane.b32.xlu1 %v260_v38, %s2129_s10 }
 0x324   :  { %v263_v39 = vpop.permute.xlu1 %262 }
 0x325   :  { %v265_v40 = vsel %vm189_vm5, %v263_v39, 0  ;;  %1704 = vmatmul.mubr.msk.bf16.vlgmr.msra.gmra.mrb[4].mxu1 %vm189_vm5, %v263_v39 }
 0x326   :  { %1696 = vmatmul.mubr.msk.bf16.vlgmr.msra.gmra.mrb[4].mxu0 %vm290_vm6, %v265_v40  ;;  %1708 = vmatpush3.bf16.msra.mxu1 %v2295_v31 }
 0x327   :  { %1720 = vmatpush3.bf16.msra.mxu0 %v2256_v1  ;;  %1709 = vmatprep.subr.bf16.mxu1 %v2126_v0 }
 0x328   :  { %1721 = vmatprep.subr.bf16.mxu0 %v2126_v0  ;;  %1723 = vmatprep.mubr.msk.bf16.mxu0 %vm2127_vm0, %v2126_v0 }
 0x329   :  { %1715 = vmatprep.mubr.msk.bf16.mxu1 %vm2127_vm0, %v2126_v0 }
 0x32a   :  { %1710 = vmatpush3.bf16.msra.mxu1 %v2298_v32 }
 0x32b   :  { %1722 = vmatpush3.bf16.msra.mxu0 %v2260_v4  ;;  %1711 = vmatprep.subr.bf16.mxu1 %v2126_v0 }
 0x32c   :  { %1727 = vmatprep.subr.bf16.mxu0 %v2126_v0 }
 0x32e   :  { %1712 = vmatpush3.bf16.msra.mxu1 %v2302_v33 }
 0x32f   :  { %1713 = vmatprep.subr.bf16.mxu1 %v2126_v0 }
 0x332   :  { %1714 = vmatpush3.bf16.msra.mxu1 %v2307_v35 }
 0x333   :  { %1739 = vmatprep.subr.bf16.mxu1 %v2126_v0 }
 0x3f8   :  { %v394_v42 = vpop.f32.mrb[4].mxu1 }
 0x3f9   :  { %v401_v43 = vrot.slane %v394_v42, 6  ;;  %v327_v44 = vpop.f32.mrb[4].mxu0  ;;  %v1705_v45 = vpop.f32.mrb[5].mxu1 }
 0x3fa   :  { %v328_v46 = vadd.f32 %v2335_v41, %v327_v44  ;;  %v1697_v47 = vpop.f32.mrb[5].mxu0  ;;  %v397_v48 = vpop.f32.mrb[6].mxu1 }
 0x3fb   :  { %v403_v49 = vadd.f32 %v401_v43, %v2273_v6  ;;  %v330_v50 = vpop.f32.mrb[6].mxu0  ;;  %v1706_v51 = vpop.f32.mrb[7].mxu1 }
 0x3fc   :  { %v1571_v52 = vmul.f32 -1.442695, %v328_v46  ;;  %v1698_v53 = vpop.f32.mrb[7].mxu0 }
 0x3fd   :  { %v404_v54 = vadd.f32 %v2280_v10, %v403_v49 }
 0x3fe   :  { %1876 = vpow2.f32 %v1571_v52 }
 0x3ff   :  { %v1573_v55 = vmul.f32 -1.442695, %v404_v54 }
 0x401   :  { %1878 = vpow2.f32 %v1573_v55 }
 0x402   :  { %1880 = vtanh.f32 %v328_v46 }
 0x408   :  { %v1877_v56 = vpop.eup %1876 }
 0x409   :  { %v337_v57 = vadd.f32 1.0, %v1877_v56 }
 0x40b   :  { %v1879_v58 = vpop.eup %1878  ;;  %1882 = vrcp.f32 %v337_v57 }
 0x40c   :  { %v409_v59 = vadd.f32 1.0, %v1879_v58  ;;  %1884 = vtanh.f32 %v404_v54  ;;  %v1881_v60 = vpop.eup %1880 }
 0x40e   :  { %1886 = vrcp.f32 %v409_v59 }
 0x415   :  { %v1883_v61 = vpop.eup %1882 }
 0x416   :  { %v340_v62 = vsel %vm2284_vm4, %v1881_v60, %v1883_v61  ;;  %v1885_v63 = vpop.eup %1884 }
 0x417   :  { %343 = vrot.lane.b32.xlu1 %v340_v62, %s2122_s17  ;;  %v341_v12 = vmul.f32 0.0, %v340_v62 }
 0x418   :  { %v1887_v2 = vpop.eup %1886 }
 0x419   :  { %v412_v3 = vsel %vm2284_vm4, %v1885_v63, %v1887_v2 }
 0x41a   :  { %418 = vrot.lane.b32.xlu0 %v412_v3, %s2122_s17  ;;  %v416_v16 = vmul.f32 %v414_v13, %v412_v3 }
 0x489   :  { %v344_v5 = vpop.permute.xlu1 %343 }
 0x48a   :  { %v346_v7 = vmul.f32 %v344_v5, %v340_v62 }
 0x48c   :  { %v419_v9 = vpop.permute.xlu0 %418  ;;  %348 = vrot.lane.b32.xlu1 %v346_v7, %s2129_s10 }
 0x48d   :  { %v421_v11 = vmul.f32 %v419_v9, %v412_v3 }
 0x48f   :  { %423 = vrot.lane.b32.xlu0 %v421_v11, %s2129_s10 }
 0x4fe   :  { %v349_v14 = vpop.permute.xlu1 %348 }
 0x4ff   :  { %v2349_v15 = vadd.f32 %v349_v14, %v341_v12 }
 0x501   :  { %1888 = vtanh.f32 %v2349_v15  ;;  %v424_v17 = vpop.permute.xlu0 %423 }
 0x502   :  { %v2352_v18 = vadd.f32 %v424_v17, %v416_v16 }
 0x504   :  { %1890 = vtanh.f32 %v2352_v18  ;;  %v575_v9 = vrot.slane %v2352_v18, 6 }
 0x50b   :  { %v1889_v19 = vpop.eup %1888 }
 0x50c   :  { %354 = vrot.lane.b32.xlu1 %v1889_v19, %s2122_s17 }
 0x50e   :  { %v1891_v20 = vpop.eup %1890 }
 0x50f   :  { %429 = vrot.lane.b32.xlu0 %v1891_v20, %s2122_s17 }
 0x57e   :  { %v355_v21 = vpop.permute.xlu1 %354 }
 0x57f   :  { %v357_v24 = vmul.f32 %v355_v21, %v340_v62 }
 0x581   :  { %v430_v23 = vpop.permute.xlu0 %429  ;;  %v434_v27 = vpack.c.bf16 %v357_v24, %v357_v24 }
 0x582   :  { %v432_v25 = vmul.f32 %v430_v23, %v412_v3 }
 0x583   :  { %v439_v29 = vrot.slane %v434_v27, 7 }
 0x584   :  { %v433_v26 = vpack.c.bf16 %v432_v25, %v432_v25 }
 0x586   :  { %v515_v28 = vrot.slane %v433_v26, 1  ;;  %436 = vrot.lane.b32.xlu1 %v433_v26, %s2129_s10 }
 0x588   :  { %516 = vrot.lane.b32.xlu0 %v515_v28, %s2129_s10 }
 0x58c   :  { %440 = vrot.lane.b32.xlu0 %v439_v29, %s2122_s17 }
 0x5f8   :  { %v437_v34 = vpop.permute.xlu1 %436 }
 0x5fa   :  { %v517_v30 = vpop.permute.xlu0 %516 }
 0x5fb   :  { %1724 = vmatmul.mubr.msk.bf16.vlgmr.msra.gmra.mrb[8].mxu0 %vm189_vm5, %v517_v30 }
 0x5fc   :  { %1728 = vmatpush3.bf16.msra.mxu0 %v2295_v31  ;;  %1735 = vmatprep.mubr.msk.bf16.mxu0 %vm2127_vm0, %v2126_v0 }
 0x5fd   :  { %1729 = vmatprep.subr.bf16.mxu0 %v2126_v0 }
 0x5fe   :  { %v441_v36 = vpop.permute.xlu0 %440 }
 0x5ff   :  { %v444_v37 = vsel %vm189_vm5, %v437_v34, %v441_v36 }
 0x600   :  { %v446_v38 = vrot.slane %v444_v37, 1  ;;  %1730 = vmatpush3.bf16.msra.mxu0 %v2298_v32 }
 0x601   :  { %1731 = vmatprep.subr.bf16.mxu0 %v2126_v0 }
 0x602   :  { %1716 = vmatmul.mubr.msk.bf16.vlgmr.msra.gmra.mrb[8].mxu1 %vm290_vm6, %v446_v38 }
 0x603   :  { %1740 = vmatpush3.bf16.msra.mxu1 %v2256_v1  ;;  %1743 = vmatprep.mubr.msk.bf16.mxu1 %vm2127_vm0, %v2126_v0 }
 0x604   :  { %1741 = vmatprep.subr.bf16.mxu1 %v2126_v0  ;;  %1732 = vmatpush3.bf16.msra.mxu0 %v2302_v33 }
 0x605   :  { %1733 = vmatprep.subr.bf16.mxu0 %v2126_v0 }
 0x607   :  { %1742 = vmatpush3.bf16.msra.mxu1 %v2260_v4 }
 0x608   :  { %1734 = vmatpush3.bf16.msra.mxu0 %v2307_v35  ;;  %1747 = vmatprep.subr.bf16.mxu1 %v2126_v0 }
 0x609   :  { %1759 = vmatprep.subr.bf16.mxu0 %v2126_v0 }
 0x6ce   :  { %v555_v39 = vpop.f32.mrb[8].mxu0 }
 0x6cf   :  { %v562_v40 = vrot.slane %v555_v39, 4  ;;  %v1725_v42 = vpop.f32.mrb[9].mxu0 }
 0x6d0   :  { %v558_v43 = vpop.f32.mrb[10].mxu0 }
 0x6d1   :  { %v564_v44 = vadd.f32 %v562_v40, %v2273_v6  ;;  %v1726_v45 = vpop.f32.mrb[11].mxu0 }
 0x6d3   :  { %v565_v46 = vadd.f32 %v2280_v10, %v564_v44 }
 0x6d5   :  { %v1577_v47 = vmul.f32 -1.442695, %v565_v46  ;;  %v484_v48 = vpop.f32.mrb[8].mxu1 }
 0x6d6   :  { %v485_v49 = vadd.f32 %v2335_v41, %v484_v48  ;;  %v1717_v50 = vpop.f32.mrb[9].mxu1 }
 0x6d7   :  { %1892 = vpow2.f32 %v1577_v47  ;;  %v487_v51 = vpop.f32.mrb[10].mxu1 }
 0x6d8   :  { %v1575_v52 = vmul.f32 -1.442695, %v485_v49  ;;  %v1718_v53 = vpop.f32.mrb[11].mxu1 }
 0x6da   :  { %1894 = vpow2.f32 %v1575_v52 }
 0x6db   :  { %1896 = vtanh.f32 %v565_v46 }
 0x6e1   :  { %v1893_v54 = vpop.eup %1892 }
 0x6e2   :  { %v570_v55 = vadd.f32 1.0, %v1893_v54 }
 0x6e4   :  { %v1895_v56 = vpop.eup %1894  ;;  %1898 = vrcp.f32 %v570_v55 }
 0x6e5   :  { %v494_v57 = vadd.f32 1.0, %v1895_v56  ;;  %1900 = vtanh.f32 %v485_v49  ;;  %v1897_v58 = vpop.eup %1896 }
 0x6e7   :  { %1902 = vrcp.f32 %v494_v57 }
 0x6ee   :  { %v1899_v59 = vpop.eup %1898 }
 0x6ef   :  { %v573_v60 = vsel %vm2284_vm4, %v1897_v58, %v1899_v59  ;;  %v1901_v61 = vpop.eup %1900 }
 0x6f0   :  { %579 = vrot.lane.b32.xlu1 %v573_v60, %s2122_s17  ;;  %v577_v11 = vmul.f32 %v575_v9, %v573_v60 }
 0x6f1   :  { %v1903_v62 = vpop.eup %1902 }
 0x6f2   :  { %v497_v63 = vsel %vm2284_vm4, %v1901_v61, %v1903_v62 }
 0x6f3   :  { %500 = vrot.lane.b32.xlu0 %v497_v63, %s2122_s17  ;;  %v498_v14 = vmul.f32 %v497_v63, %v2349_v15 }
 0x762   :  { %v580_v2 = vpop.permute.xlu1 %579 }
 0x763   :  { %v582_v3 = vmul.f32 %v580_v2, %v573_v60 }
 0x765   :  { %v501_v5 = vpop.permute.xlu0 %500  ;;  %584 = vrot.lane.b32.xlu1 %v582_v3, %s2129_s10 }
 0x766   :  { %v503_v7 = vmul.f32 %v501_v5, %v497_v63 }
 0x768   :  { %505 = vrot.lane.b32.xlu0 %v503_v7, %s2129_s10 }
 0x7d7   :  { %v585_v12 = vpop.permute.xlu1 %584 }
 0x7d8   :  { %v2391_v13 = vadd.f32 %v585_v12, %v577_v11 }
 0x7da   :  { %1904 = vtanh.f32 %v2391_v13  ;;  %v506_v16 = vpop.permute.xlu0 %505  ;;  %v736_v3 = vrot.slane %v2391_v13, 6 }
 0x7db   :  { %v2395_v17 = vadd.f32 %v506_v16, %v498_v14 }
 0x7dd   :  { %1906 = vtanh.f32 %v2395_v17 }
 0x7e4   :  { %v1905_v19 = vpop.eup %1904 }
 0x7e5   :  { %590 = vrot.lane.b32.xlu1 %v1905_v19, %s2122_s17 }
 0x7e7   :  { %v1907_v20 = vpop.eup %1906 }
 0x7e8   :  { %511 = vrot.lane.b32.xlu0 %v1907_v20, %s2122_s17 }
 0x857   :  { %v591_v18 = vpop.permute.xlu1 %590 }
 0x858   :  { %v593_v21 = vmul.f32 %v591_v18, %v573_v60 }
 0x85a   :  { %v594_v23 = vpack.c.bf16 %v593_v21, %v593_v21  ;;  %v512_v24 = vpop.permute.xlu0 %511 }
 0x85b   :  { %v514_v25 = vmul.f32 %v512_v24, %v497_v63 }
 0x85c   :  { %v676_v26 = vrot.slane %v594_v23, 2  ;;  %597 = vrot.lane.b32.xlu0 %v594_v23, %s2129_s10 }
 0x85d   :  { %v595_v15 = vpack.c.bf16 %v514_v25, %v514_v25 }
 0x85e   :  { %677 = vrot.lane.b32.xlu1 %v676_v26, %s2129_s10 }
 0x85f   :  { %v600_v27 = vrot.slane %v595_v15, 6 }
 0x862   :  { %601 = vrot.lane.b32.xlu1 %v600_v27, %s2122_s17 }
 0x8ce   :  { %v598_v29 = vpop.permute.xlu0 %597 }
 0x8d0   :  { %v678_v28 = vpop.permute.xlu1 %677 }
 0x8d1   :  { %1744 = vmatmul.mubr.msk.bf16.vlgmr.msra.gmra.mrb[12].mxu1 %vm189_vm5, %v678_v28 }
 0x8d2   :  { %1748 = vmatpush3.bf16.msra.mxu1 %v2295_v31  ;;  %1755 = vmatprep.mubr.msk.bf16.mxu1 %vm2127_vm0, %v2126_v0 }
 0x8d3   :  { %1749 = vmatprep.subr.bf16.mxu1 %v2126_v0 }
 0x8d4   :  { %v602_v30 = vpop.permute.xlu1 %601 }
 0x8d5   :  { %v605_v34 = vsel %vm189_vm5, %v598_v29, %v602_v30 }
 0x8d6   :  { %v607_v36 = vrot.slane %v605_v34, 2  ;;  %1750 = vmatpush3.bf16.msra.mxu1 %v2298_v32 }
 0x8d7   :  { %1751 = vmatprep.subr.bf16.mxu1 %v2126_v0 }
 0x8d8   :  { %1736 = vmatmul.mubr.msk.bf16.vlgmr.msra.gmra.mrb[12].mxu0 %vm290_vm6, %v607_v36 }
 0x8d9   :  { %1760 = vmatpush3.bf16.msra.mxu0 %v2256_v1  ;;  %1763 = vmatprep.mubr.msk.bf16.mxu0 %vm2127_vm0, %v2126_v0 }
 0x8da   :  { %1761 = vmatprep.subr.bf16.mxu0 %v2126_v0  ;;  %1752 = vmatpush3.bf16.msra.mxu1 %v2302_v33 }
 0x8db   :  { %1753 = vmatprep.subr.bf16.mxu1 %v2126_v0 }
 0x8dd   :  { %1762 = vmatpush3.bf16.msra.mxu0 %v2260_v4 }
 0x8de   :  { %1754 = vmatpush3.bf16.msra.mxu1 %v2307_v35  ;;  %1767 = vmatprep.subr.bf16.mxu0 %v2126_v0 }
 0x8df   :  { %1779 = vmatprep.subr.bf16.mxu1 %v2126_v0 }
 0x9a4   :  { %v716_v37 = vpop.f32.mrb[12].mxu1 }
 0x9a5   :  { %v723_v38 = vrot.slane %v716_v37, 2  ;;  %v1745_v39 = vpop.f32.mrb[13].mxu1 }
 0x9a6   :  { %v719_v40 = vpop.f32.mrb[14].mxu1 }
 0x9a7   :  { %v725_v42 = vadd.f32 %v723_v38, %v2273_v6  ;;  %v1746_v43 = vpop.f32.mrb[15].mxu1 }
 0x9a9   :  { %v726_v44 = vadd.f32 %v2280_v10, %v725_v42 }
 0x9ab   :  { %v1581_v45 = vmul.f32 -1.442695, %v726_v44  ;;  %v645_v46 = vpop.f32.mrb[12].mxu0 }
 0x9ac   :  { %v646_v47 = vadd.f32 %v2335_v41, %v645_v46  ;;  %v1737_v48 = vpop.f32.mrb[13].mxu0 }
 0x9ad   :  { %1908 = vpow2.f32 %v1581_v45  ;;  %v648_v49 = vpop.f32.mrb[14].mxu0 }
 0x9ae   :  { %v1579_v50 = vmul.f32 -1.442695, %v646_v47  ;;  %v1738_v51 = vpop.f32.mrb[15].mxu0 }
 0x9b0   :  { %1910 = vpow2.f32 %v1579_v50 }
 0x9b1   :  { %1912 = vtanh.f32 %v726_v44 }
 0x9b7   :  { %v1909_v52 = vpop.eup %1908 }
 0x9b8   :  { %v731_v53 = vadd.f32 1.0, %v1909_v52 }
 0x9ba   :  { %v1911_v54 = vpop.eup %1910  ;;  %1914 = vrcp.f32 %v731_v53 }
 0x9bb   :  { %v655_v55 = vadd.f32 1.0, %v1911_v54  ;;  %1916 = vtanh.f32 %v646_v47  ;;  %v1913_v6 = vpop.eup %1912 }
 0x9bd   :  { %1918 = vrcp.f32 %v655_v55 }
 0x9c4   :  { %v1915_v56 = vpop.eup %1914 }
 0x9c5   :  { %v734_v57 = vsel %vm2284_vm4, %v1913_v6, %v1915_v56  ;;  %v1917_v58 = vpop.eup %1916 }
 0x9c6   :  { %740 = vrot.lane.b32.xlu0 %v734_v57, %s2122_s17  ;;  %v738_v5 = vmul.f32 %v736_v3, %v734_v57 }
 0x9c7   :  { %v1919_v59 = vpop.eup %1918 }
 0x9c8   :  { %v658_v60 = vsel %vm2284_vm4, %v1917_v58, %v1919_v59 }
 0x9c9   :  { %661 = vrot.lane.b32.xlu1 %v658_v60, %s2122_s17  ;;  %v659_v11 = vmul.f32 %v658_v60, %v2395_v17 }
 0xa38   :  { %v741_v61 = vpop.permute.xlu0 %740 }
 0xa39   :  { %v743_v62 = vmul.f32 %v741_v61, %v734_v57 }
 0xa3b   :  { %745 = vrot.lane.b32.xlu0 %v743_v62, %s2129_s10  ;;  %v662_v63 = vpop.permute.xlu1 %661 }
 0xa3c   :  { %v664_v2 = vmul.f32 %v662_v63, %v658_v60 }
 0xa3e   :  { %666 = vrot.lane.b32.xlu1 %v664_v2, %s2129_s10 }
 0xaad   :  { %v746_v7 = vpop.permute.xlu0 %745 }
 0xaae   :  { %v2434_v9 = vadd.f32 %v746_v7, %v738_v5 }
 0xab0   :  { %1920 = vtanh.f32 %v2434_v9  ;;  %v667_v12 = vpop.permute.xlu1 %666  ;;  %v894_v61 = vrot.slane %v2434_v9, 6 }
 0xab1   :  { %v2438_v14 = vadd.f32 %v667_v12, %v659_v11 }
 0xab3   :  { %1922 = vtanh.f32 %v2438_v14 }
 0xaba   :  { %v1921_v16 = vpop.eup %1920 }
 0xabb   :  { %751 = vrot.lane.b32.xlu0 %v1921_v16, %s2122_s17 }
 0xabd   :  { %v1923_v19 = vpop.eup %1922 }
 0xabe   :  { %672 = vrot.lane.b32.xlu1 %v1923_v19, %s2122_s17 }
 0xb2d   :  { %v752_v13 = vpop.permute.xlu0 %751 }
 0xb2e   :  { %v754_v20 = vmul.f32 %v752_v13, %v734_v57 }
 0xb30   :  { %v755_v18 = vpack.c.bf16 %v754_v20, %v754_v20  ;;  %v673_v21 = vpop.permute.xlu1 %672 }
 0xb31   :  { %v675_v23 = vmul.f32 %v673_v21, %v658_v60 }
 0xb32   :  { %v837_v24 = vrot.slane %v755_v18, 3  ;;  %758 = vrot.lane.b32.xlu1 %v755_v18, %s2129_s10 }
 0xb33   :  { %v756_v17 = vpack.c.bf16 %v675_v23, %v675_v23 }
 0xb34   :  { %838 = vrot.lane.b32.xlu0 %v837_v24, %s2129_s10 }
 0xb35   :  { %v761_v25 = vrot.slane %v756_v17, 5 }
 0xb38   :  { %762 = vrot.lane.b32.xlu0 %v761_v25, %s2122_s17 }
 0xba4   :  { %v759_v15 = vpop.permute.xlu1 %758 }
 0xba6   :  { %v839_v26 = vpop.permute.xlu0 %838 }
 0xba7   :  { %1764 = vmatmul.mubr.msk.bf16.vlgmr.msra.gmra.mrb[16].mxu0 %vm189_vm5, %v839_v26 }
 0xba8   :  { %1768 = vmatpush3.bf16.msra.mxu0 %v2295_v31  ;;  %1775 = vmatprep.mubr.msk.bf16.mxu0 %vm2127_vm0, %v2126_v0 }
 0xba9   :  { %1769 = vmatprep.subr.bf16.mxu0 %v2126_v0 }
 0xbaa   :  { %v763_v27 = vpop.permute.xlu0 %762 }
 0xbab   :  { %v766_v28 = vsel %vm189_vm5, %v759_v15, %v763_v27 }
 0xbac   :  { %v768_v29 = vrot.slane %v766_v28, 3  ;;  %1770 = vmatpush3.bf16.msra.mxu0 %v2298_v32 }
 0xbad   :  { %1771 = vmatprep.subr.bf16.mxu0 %v2126_v0 }
 0xbae   :  { %1756 = vmatmul.mubr.msk.bf16.vlgmr.msra.gmra.mrb[16].mxu1 %vm290_vm6, %v768_v29 }
 0xbaf   :  { %1780 = vmatpush3.bf16.msra.mxu1 %v2256_v1  ;;  %1783 = vmatprep.mubr.msk.bf16.mxu1 %vm2127_vm0, %v2126_v0 }
 0xbb0   :  { %1781 = vmatprep.subr.bf16.mxu1 %v2126_v0  ;;  %1772 = vmatpush3.bf16.msra.mxu0 %v2302_v33 }
 0xbb1   :  { %1773 = vmatprep.subr.bf16.mxu0 %v2126_v0 }
 0xbb3   :  { %1782 = vmatpush3.bf16.msra.mxu1 %v2260_v4 }
 0xbb4   :  { %1774 = vmatpush3.bf16.msra.mxu0 %v2307_v35  ;;  %1787 = vmatprep.subr.bf16.mxu1 %v2126_v0 }
 0xbb5   :  { %1799 = vmatprep.subr.bf16.mxu0 %v2126_v0 }
 0xc7a   :  { %v877_v30 = vpop.f32.mrb[16].mxu0 }
 0xc7b   :  { %v883_v34 = vadd.f32 %v877_v30, %v2275_v8  ;;  %v1765_v36 = vpop.f32.mrb[17].mxu0 }
 0xc7c   :  { %v880_v37 = vpop.f32.mrb[18].mxu0 }
 0xc7d   :  { %v884_v38 = vadd.f32 %v2280_v10, %v883_v34  ;;  %v1766_v39 = vpop.f32.mrb[19].mxu0 }
 0xc7f   :  { %v1585_v40 = vmul.f32 -1.442695, %v884_v38 }
 0xc81   :  { %1924 = vpow2.f32 %v1585_v40  ;;  %v806_v42 = vpop.f32.mrb[16].mxu1 }
 0xc82   :  { %v807_v43 = vadd.f32 %v2335_v41, %v806_v42  ;;  %v1757_v44 = vpop.f32.mrb[17].mxu1 }
 0xc83   :  { %v809_v45 = vpop.f32.mrb[18].mxu1 }
 0xc84   :  { %v1583_v46 = vmul.f32 -1.442695, %v807_v43  ;;  %v1758_v47 = vpop.f32.mrb[19].mxu1 }
 0xc86   :  { %1926 = vpow2.f32 %v1583_v46 }
 0xc87   :  { %1928 = vtanh.f32 %v884_v38 }
 0xc8b   :  { %v1925_v48 = vpop.eup %1924 }
 0xc8c   :  { %v889_v49 = vadd.f32 1.0, %v1925_v48 }
 0xc8e   :  { %1930 = vrcp.f32 %v889_v49 }
 0xc8f   :  { %1932 = vtanh.f32 %v807_v43 }
 0xc90   :  { %v1927_v50 = vpop.eup %1926 }
 0xc91   :  { %v816_v51 = vadd.f32 1.0, %v1927_v50  ;;  %v1929_v52 = vpop.eup %1928 }
 0xc93   :  { %1934 = vrcp.f32 %v816_v51 }
 0xc98   :  { %v1931_v53 = vpop.eup %1930 }
 0xc99   :  { %v892_v54 = vsel %vm2284_vm4, %v1929_v52, %v1931_v53  ;;  %v1933_v55 = vpop.eup %1932 }
 0xc9a   :  { %898 = vrot.lane.b32.xlu1 %v892_v54, %s2122_s17  ;;  %v896_v62 = vmul.f32 %v894_v61, %v892_v54 }
 0xc9d   :  { %v1935_v6 = vpop.eup %1934 }
 0xc9e   :  { %v819_v56 = vsel %vm2284_vm4, %v1933_v55, %v1935_v6 }
 0xc9f   :  { %822 = vrot.lane.b32.xlu0 %v819_v56, %s2122_s17  ;;  %v820_v3 = vmul.f32 %v819_v56, %v2438_v14 }
 0xd0c   :  { %v899_v57 = vpop.permute.xlu1 %898 }
 0xd0d   :  { %v901_v58 = vmul.f32 %v899_v57, %v892_v54 }
 0xd0f   :  { %903 = vrot.lane.b32.xlu1 %v901_v58, %s2129_s10 }
 0xd11   :  { %v823_v59 = vpop.permute.xlu0 %822 }
 0xd12   :  { %v825_v60 = vmul.f32 %v823_v59, %v819_v56 }
 0xd14   :  { %827 = vrot.lane.b32.xlu0 %v825_v60, %s2129_s10 }
 0xd81   :  { %v904_v63 = vpop.permute.xlu1 %903 }
 0xd82   :  { %v2477_v2 = vadd.f32 %v904_v63, %v896_v62 }
 0xd84   :  { %1936 = vtanh.f32 %v2477_v2  ;;  %v1047_v55 = vrot.slane %v2477_v2, 6 }
 0xd86   :  { %v828_v5 = vpop.permute.xlu0 %827 }
 0xd87   :  { %v2481_v7 = vadd.f32 %v828_v5, %v820_v3 }
 0xd89   :  { %1938 = vtanh.f32 %v2481_v7 }
 0xd8e   :  { %v1937_v11 = vpop.eup %1936 }
 0xd8f   :  { %909 = vrot.lane.b32.xlu1 %v1937_v11, %s2122_s17 }
 0xd93   :  { %v1939_v12 = vpop.eup %1938 }
 0xd94   :  { %833 = vrot.lane.b32.xlu0 %v1939_v12, %s2122_s17 }
 0xe01   :  { %v910_v9 = vpop.permute.xlu1 %909 }
 0xe02   :  { %v912_v16 = vmul.f32 %v910_v9, %v892_v54 }
 0xe04   :  { %v913_v19 = vpack.c.bf16 %v912_v16, %v912_v16 }
 0xe06   :  { %v834_v13 = vpop.permute.xlu0 %833  ;;  %916 = vrot.lane.b32.xlu1 %v913_v19, %s2129_s10 }
 0xe07   :  { %v836_v20 = vmul.f32 %v834_v13, %v819_v56 }
 0xe09   :  { %v914_v18 = vpack.c.bf16 %v836_v20, %v836_v20 }
 0xe0b   :  { %919 = vrot.lane.b32.xlu0 %v914_v18, %s2122_s17 }
 0xe78   :  { %v917_v14 = vpop.permute.xlu1 %916 }
 0xe79   :  { %1784 = vmatmul.mubr.msk.bf16.vlgmr.msra.gmra.mrb[20].mxu1 %vm189_vm5, %v917_v14 }
 0xe7a   :  { %1788 = vmatpush3.bf16.msra.mxu1 %v2295_v31  ;;  %1795 = vmatprep.mubr.msk.bf16.mxu1 %vm2127_vm0, %v2126_v0 }
 0xe7b   :  { %1789 = vmatprep.subr.bf16.mxu1 %v2126_v0 }
 0xe7d   :  { %v920_v21 = vpop.permute.xlu0 %919 }
 0xe7e   :  { %v923_v23 = vsel %vm189_vm5, %v917_v14, %v920_v21  ;;  %1790 = vmatpush3.bf16.msra.mxu1 %v2298_v32 }
 0xe7f   :  { %1776 = vmatmul.mubr.msk.bf16.vlgmr.msra.gmra.mrb[20].mxu0 %vm290_vm6, %v923_v23  ;;  %1791 = vmatprep.subr.bf16.mxu1 %v2126_v0 }
 0xe80   :  { %1800 = vmatpush3.bf16.msra.mxu0 %v2256_v1  ;;  %1803 = vmatprep.mubr.msk.bf16.mxu0 %vm2127_vm0, %v2126_v0 }
 0xe81   :  { %1801 = vmatprep.subr.bf16.mxu0 %v2126_v0 }
 0xe82   :  { %1792 = vmatpush3.bf16.msra.mxu1 %v2302_v33 }
 0xe83   :  { %1793 = vmatprep.subr.bf16.mxu1 %v2126_v0 }
 0xe84   :  { %1802 = vmatpush3.bf16.msra.mxu0 %v2260_v4 }
 0xe85   :  { %1807 = vmatprep.subr.bf16.mxu0 %v2126_v0 }
 0xe86   :  { %1794 = vmatpush3.bf16.msra.mxu1 %v2307_v35 }
 0xe87   :  { %1819 = vmatprep.subr.bf16.mxu1 %v2126_v0 }
 0xf4c   :  { %v1027_v24 = vpop.f32.mrb[20].mxu1 }
 0xf4d   :  { %v1034_v17 = vrot.slane %v1027_v24, 6  ;;  %v1785_v25 = vpop.f32.mrb[21].mxu1 }
 0xf4e   :  { %v1030_v26 = vpop.f32.mrb[22].mxu1 }
 0xf4f   :  { %v1036_v15 = vadd.f32 %v1034_v17, %v2275_v8  ;;  %v1786_v27 = vpop.f32.mrb[23].mxu1 }
 0xf51   :  { %v1037_v28 = vadd.f32 %v2280_v10, %v1036_v15 }
 0xf52   :  { %v960_v29 = vpop.f32.mrb[20].mxu0 }
 0xf53   :  { %v1589_v30 = vmul.f32 -1.442695, %v1037_v28  ;;  %v961_v34 = vadd.f32 %v2335_v41, %v960_v29  ;;  %v1777_v36 = vpop.f32.mrb[21].mxu0 }
 0xf54   :  { %v963_v37 = vpop.f32.mrb[22].mxu0 }
 0xf55   :  { %1940 = vpow2.f32 %v1589_v30  ;;  %v1587_v38 = vmul.f32 -1.442695, %v961_v34  ;;  %v1778_v39 = vpop.f32.mrb[23].mxu0 }
 0xf57   :  { %1942 = vpow2.f32 %v1587_v38 }
 0xf58   :  { %1944 = vtanh.f32 %v1037_v28 }
 0xf5f   :  { %v1941_v40 = vpop.eup %1940 }
 0xf60   :  { %v1042_v42 = vadd.f32 1.0, %v1941_v40 }
 0xf61   :  { %v1943_v43 = vpop.eup %1942 }
 0xf62   :  { %1946 = vrcp.f32 %v1042_v42  ;;  %v970_v44 = vadd.f32 1.0, %v1943_v43  ;;  %v1945_v45 = vpop.eup %1944 }
 0xf63   :  { %1948 = vtanh.f32 %v961_v34 }
 0xf64   :  { %1950 = vrcp.f32 %v970_v44 }
 0xf6c   :  { %v1947_v46 = vpop.eup %1946 }
 0xf6d   :  { %v1949_v47 = vpop.eup %1948  ;;  %v1045_v48 = vsel %vm2284_vm4, %v1945_v45, %v1947_v46 }
 0xf6e   :  { %v1951_v49 = vpop.eup %1950  ;;  %1051 = vrot.lane.b32.xlu0 %v1045_v48, %s2122_s17  ;;  %v1049_v6 = vmul.f32 %v1047_v55, %v1045_v48 }
 0xf6f   :  { %v973_v50 = vsel %vm2284_vm4, %v1949_v47, %v1951_v49 }
 0xf70   :  { %976 = vrot.lane.b32.xlu1 %v973_v50, %s2122_s17  ;;  %v974_v58 = vmul.f32 %v973_v50, %v2481_v7 }
 0xfe0   :  { %v1052_v51 = vpop.permute.xlu0 %1051 }
 0xfe1   :  { %v1054_v52 = vmul.f32 %v1052_v51, %v1045_v48 }
 0xfe2   :  { %v977_v53 = vpop.permute.xlu1 %976 }
 0xfe3   :  { %v979_v54 = vmul.f32 %v977_v53, %v973_v50  ;;  %1056 = vrot.lane.b32.xlu0 %v1054_v52, %s2129_s10 }
 0xfe5   :  { %981 = vrot.lane.b32.xlu1 %v979_v54, %s2129_s10 }
0x1055   :  { %v1057_v56 = vpop.permute.xlu0 %1056 }
0x1056   :  { %v2519_v57 = vadd.f32 %v1057_v56, %v1049_v6 }
0x1057   :  { %v982_v59 = vpop.permute.xlu1 %981 }
0x1058   :  { %1952 = vtanh.f32 %v2519_v57  ;;  %v2523_v60 = vadd.f32 %v982_v59, %v974_v58  ;;  %v1208_v45 = vrot.slane %v2519_v57, 6 }
0x105a   :  { %1954 = vtanh.f32 %v2523_v60 }
0x1062   :  { %v1953_v61 = vpop.eup %1952 }
0x1063   :  { %1062 = vrot.lane.b32.xlu0 %v1953_v61, %s2122_s17 }
0x1064   :  { %v1955_v62 = vpop.eup %1954 }
0x1065   :  { %987 = vrot.lane.b32.xlu1 %v1955_v62, %s2122_s17 }
0x10d5   :  { %v1063_v63 = vpop.permute.xlu0 %1062 }
0x10d6   :  { %v1065_v2 = vmul.f32 %v1063_v63, %v1045_v48 }
0x10d7   :  { %v988_v3 = vpop.permute.xlu1 %987 }
0x10d8   :  { %v1066_v5 = vpack.c.bf16 %v1065_v2, %v1065_v2  ;;  %v990_v11 = vmul.f32 %v988_v3, %v973_v50 }
0x10da   :  { %v1067_v12 = vpack.c.bf16 %v990_v11, %v990_v11  ;;  %1069 = vrot.lane.b32.xlu1 %v1066_v5, %s2129_s10  ;;  %v1148_v7 = vrot.slane %v1066_v5, 1  ;;  %v1996_v5 = vld [vmem:[#allocation8] sm:$0xff]   ;;  %v1997_v11 = vld [vmem:[#allocation8 + $0x8] sm:$0xff]  }
0x10dc   :  { %v1072_v9 = vrot.slane %v1067_v12, 7  ;;  %v1998_v12 = vld [vmem:[#allocation8 + $0x10] sm:$0xff]  }
0x10de   :  { %1149 = vrot.lane.b32.xlu1 %v1148_v7, %s2129_s10  ;;  %1073 = vrot.lane.b32.xlu0 %v1072_v9, %s2122_s17  ;;  %v1999_v7 = vld [vmem:[#allocation8 + $0x18] sm:$0xff]  }
0x114c   :  { %v1070_v16 = vpop.permute.xlu1 %1069 }
0x1150   :  { %v1074_v19 = vpop.permute.xlu0 %1073  ;;  %v1150_v13 = vpop.permute.xlu1 %1149 }
0x1151   :  { %v1077_v20 = vsel %vm189_vm5, %v1070_v16, %v1074_v19  ;;  %1804 = vmatmul.mubr.msk.bf16.vlgmr.msra.gmra.mrb[24].mxu0 %vm189_vm5, %v1150_v13 }
0x1152   :  { %v1079_v18 = vrot.slane %v1077_v20, 1  ;;  %1808 = vmatpush3.bf16.msra.mxu0 %v2295_v31  ;;  %1815 = vmatprep.mubr.msk.bf16.mxu0 %vm2127_vm0, %v2126_v0 }
0x1153   :  { %1809 = vmatprep.subr.bf16.mxu0 %v2126_v0 }
0x1154   :  { %1796 = vmatmul.mubr.msk.bf16.vlgmr.msra.gmra.mrb[24].mxu1 %vm290_vm6, %v1079_v18 }
0x1155   :  { %1820 = vmatpush3.bf16.msra.mxu1 %v2256_v1  ;;  %1823 = vmatprep.mubr.msk.bf16.mxu1 %vm2127_vm0, %v2126_v0 }
0x1156   :  { %1810 = vmatpush3.bf16.msra.mxu0 %v2298_v32  ;;  %1821 = vmatprep.subr.bf16.mxu1 %v2126_v0 }
0x1157   :  { %1811 = vmatprep.subr.bf16.mxu0 %v2126_v0 }
0x1159   :  { %1822 = vmatpush3.bf16.msra.mxu1 %v2260_v4 }
0x115a   :  { %1812 = vmatpush3.bf16.msra.mxu0 %v2302_v33  ;;  %1827 = vmatprep.subr.bf16.mxu1 %v2126_v0 }
0x115b   :  { %1813 = vmatprep.subr.bf16.mxu0 %v2126_v0 }
0x115e   :  { %1814 = vmatpush3.bf16.msra.mxu0 %v2307_v35 }
0x115f   :  { %1839 = vmatprep.subr.bf16.mxu0 %v2126_v0 }
0x1224   :  { %v1188_v1 = vpop.f32.mrb[24].mxu0 }
0x1225   :  { %v1195_v31 = vrot.slane %v1188_v1, 4  ;;  %v1805_v14 = vpop.f32.mrb[25].mxu0 }
0x1226   :  { %v1191_v32 = vpop.f32.mrb[26].mxu0 }
0x1227   :  { %v1197_v21 = vadd.f32 %v1195_v31, %v2275_v8  ;;  %v1117_v23 = vpop.f32.mrb[24].mxu1  ;;  %v1806_v24 = vpop.f32.mrb[27].mxu0 }
0x1228   :  { %v1118_v4 = vadd.f32 %v2335_v41, %v1117_v23  ;;  %v1797_v17 = vpop.f32.mrb[25].mxu1  ;;  %v2000_v24 = vld [vmem:[%s2640_s3] ss:$0 sm:$0xff] }
0x1229   :  { %v1198_v33 = vadd.f32 %v2280_v10, %v1197_v21  ;;  %v1120_v25 = vpop.f32.mrb[26].mxu1 }
0x122a   :  { %v1591_v26 = vmul.f32 -1.442695, %v1118_v4  ;;  %v1798_v15 = vpop.f32.mrb[27].mxu1 }
0x122b   :  { %v1593_v27 = vmul.f32 -1.442695, %v1198_v33 }
0x122c   :  { %1956 = vpow2.f32 %v1591_v26 }
0x122d   :  { %1958 = vpow2.f32 %v1593_v27 }
0x122e   :  { %1960 = vtanh.f32 %v1118_v4 }
0x122f   :  { %1962 = vtanh.f32 %v1198_v33 }
0x1236   :  { %v1957_v35 = vpop.eup %1956 }
0x1237   :  { %v1959_v28 = vpop.eup %1958  ;;  %v1127_v29 = vadd.f32 1.0, %v1957_v35 }
0x1238   :  { %v1203_v30 = vadd.f32 1.0, %v1959_v28  ;;  %v1961_v34 = vpop.eup %1960 }
0x1239   :  { %1964 = vrcp.f32 %v1127_v29  ;;  %v1963_v36 = vpop.eup %1962 }
0x123a   :  { %1966 = vrcp.f32 %v1203_v30 }
0x1243   :  { %v1965_v37 = vpop.eup %1964 }
0x1244   :  { %v1967_v38 = vpop.eup %1966  ;;  %v1130_v10 = vsel %vm2284_vm4, %v1961_v34, %v1965_v37 }
0x1245   :  { %1133 = vrot.lane.b32.xlu0 %v1130_v10, %s2122_s17  ;;  %v1206_v39 = vsel %vm2284_vm4, %v1963_v36, %v1967_v38  ;;  %v1131_v46 = vmul.f32 %v1130_v10, %v2523_v60 }
0x1246   :  { %1212 = vrot.lane.b32.xlu1 %v1206_v39, %s2122_s17  ;;  %v1210_v48 = vmul.f32 %v1208_v45, %v1206_v39 }
0x12b7   :  { %v1134_v40 = vpop.permute.xlu0 %1133 }
0x12b8   :  { %v1136_v42 = vmul.f32 %v1134_v40, %v1130_v10  ;;  %v1213_v43 = vpop.permute.xlu1 %1212 }
0x12b9   :  { %v1215_v44 = vmul.f32 %v1213_v43, %v1206_v39 }
0x12ba   :  { %1138 = vrot.lane.b32.xlu0 %v1136_v42, %s2129_s10 }
0x12bb   :  { %1217 = vrot.lane.b32.xlu1 %v1215_v44, %s2129_s10 }
0x132c   :  { %v1139_v47 = vpop.permute.xlu0 %1138 }
0x132d   :  { %v2563_v49 = vadd.f32 %v1139_v47, %v1131_v46  ;;  %v1218_v50 = vpop.permute.xlu1 %1217 }
0x132e   :  { %v2565_v51 = vadd.f32 %v1218_v50, %v1210_v48 }
0x132f   :  { %1968 = vtanh.f32 %v2563_v49 }
0x1330   :  { %1970 = vtanh.f32 %v2565_v51 }
0x1339   :  { %v1969_v52 = vpop.eup %1968 }
0x133a   :  { %v1971_v53 = vpop.eup %1970  ;;  %1144 = vrot.lane.b32.xlu0 %v1969_v52, %s2122_s17 }
0x133b   :  { %1223 = vrot.lane.b32.xlu1 %v1971_v53, %s2122_s17 }
0x13ac   :  { %v1145_v54 = vpop.permute.xlu0 %1144 }
0x13ad   :  { %v1147_v55 = vmul.f32 %v1145_v54, %v1130_v10  ;;  %v1224_v6 = vpop.permute.xlu1 %1223 }
0x13ae   :  { %v1226_v56 = vmul.f32 %v1224_v6, %v1206_v39  ;;  %v1369_v39 = vrot.slane %v2565_v51, 6 }
0x13af   :  { %v1228_v57 = vpack.c.bf16 %v1147_v55, %v1147_v55 }
0x13b0   :  { %v1227_v58 = vpack.c.bf16 %v1226_v56, %v1226_v56 }
0x13b1   :  { %v1233_v59 = vrot.slane %v1228_v57, 6 }
0x13b2   :  { %1230 = vrot.lane.b32.xlu0 %v1227_v58, %s2129_s10  ;;  %v1309_v60 = vrot.slane %v1227_v58, 2  ;;  %v2001_v58 = vld [vmem:[%s2642_s5] ss:$0 sm:$0xff] }
0x13b3   :  { %1234 = vrot.lane.b32.xlu1 %v1233_v59, %s2122_s17 }
0x13b6   :  { %1310 = vrot.lane.b32.xlu0 %v1309_v60, %s2129_s10 }
0x1424   :  { %v1231_v61 = vpop.permute.xlu0 %1230 }
0x1425   :  { %v1235_v62 = vpop.permute.xlu1 %1234 }
0x1426   :  { %v1238_v63 = vsel %vm189_vm5, %v1231_v61, %v1235_v62 }
0x1427   :  { %v1240_v2 = vrot.slane %v1238_v63, 2 }
0x1428   :  { %v1311_v3 = vpop.permute.xlu0 %1310 }
0x1429   :  { %1816 = vmatmul.mubr.msk.bf16.vlgmr.msra.gmra.mrb[28].mxu0 %vm290_vm6, %v1240_v2  ;;  %1824 = vmatmul.mubr.msk.bf16.vlgmr.msra.gmra.mrb[28].mxu1 %vm189_vm5, %v1311_v3 }
0x142a   :  { %1828 = vmatpush3.bf16.msra.mxu1 %v1996_v5  ;;  %1835 = vmatprep.mubr.msk.bf16.mxu1 %vm2127_vm0, %v2126_v0 }
0x142b   :  { %1829 = vmatprep.subr.bf16.mxu1 %v2126_v0  ;;  %1843 = vmatprep.mubr.msk.bf16.mxu0 %vm2127_vm0, %v2126_v0 }
0x142e   :  { %1830 = vmatpush3.bf16.msra.mxu1 %v1997_v11 }
0x142f   :  { %1831 = vmatprep.subr.bf16.mxu1 %v2126_v0 }
0x1432   :  { %1832 = vmatpush3.bf16.msra.mxu1 %v1998_v12 }
0x1433   :  { %1833 = vmatprep.subr.bf16.mxu1 %v2126_v0 }
0x1436   :  { %1834 = vmatpush3.bf16.msra.mxu1 %v1999_v7 }
0x14fc   :  { %v1278_v9 = vpop.f32.mrb[28].mxu0  ;;  %v1349_v16 = vpop.f32.mrb[28].mxu1 }
0x14fd   :  { %v1279_v19 = vadd.f32 %v2335_v41, %v1278_v9  ;;  %v1356_v13 = vrot.slane %v1349_v16, 2  ;;  %v1817_v20 = vpop.f32.mrb[29].mxu0  ;;  %v1825_v18 = vpop.f32.mrb[29].mxu1 }
0x14fe   :  { %v1281_v1 = vpop.f32.mrb[30].mxu0  ;;  %v1352_v31 = vpop.f32.mrb[30].mxu1  ;;  %v1866_v20 = vld [vmem:[%s2643_s6] sm:$0xff]   ;;  %s1547_s6 = sshll.u32 %s2130_s30, 4  ;;  %s1548_s6 = int_to_ptr.vmem [resolvable:$true] %s1547_s6 }
0x14ff   :  { %v1595_v14 = vmul.f32 -1.442695, %v1279_v19  ;;  %v1358_v32 = vadd.f32 %v1356_v13, %v2275_v8  ;;  %v1818_v21 = vpop.f32.mrb[31].mxu0  ;;  %v1826_v23 = vpop.f32.mrb[31].mxu1  ;;  %1840 = vmatpush3.bf16.msra.mxu0 %v1866_v20  ;;  %p2095_p5 = scmp.lt.s32.totalorder %s1548_s6, %s1548_s6 }
0x1500   :  { %1841 = vmatprep.subr.bf16.mxu0 %v2126_v0  ;;  %v1600_v21 = vld [vmem:[%s2644_s7] ss:$0 sm:$0xff] }
0x1501   :  { %1972 = vpow2.f32 %v1595_v14  ;;  %v1359_v4 = vadd.f32 %v2000_v24, %v1358_v32 }
0x1503   :  { %v1597_v17 = vmul.f32 -1.442695, %v1359_v4  ;;  %1842 = vmatpush3.bf16.msra.mxu0 %v1867_v22 }
0x1505   :  { %1974 = vpow2.f32 %v1597_v17 }
0x1506   :  { %1976 = vtanh.f32 %v1279_v19 }
0x150b   :  { %v1973_v33 = vpop.eup %1972 }
0x150c   :  { %v1288_v41 = vadd.f32 1.0, %v1973_v33 }
0x150e   :  { %1978 = vrcp.f32 %v1288_v41 }
0x150f   :  { %v1975_v25 = vpop.eup %1974  ;;  %1980 = vtanh.f32 %v1359_v4 }
0x1510   :  { %v1364_v26 = vadd.f32 1.0, %v1975_v25  ;;  %v1977_v15 = vpop.eup %1976 }
0x1512   :  { %1982 = vrcp.f32 %v1364_v26 }
0x1518   :  { %v1979_v8 = vpop.eup %1978 }
0x1519   :  { %v1291_v27 = vsel %vm2284_vm4, %v1977_v15, %v1979_v8  ;;  %v1981_v35 = vpop.eup %1980 }
0x151a   :  { %1294 = vrot.lane.b32.xlu1 %v1291_v27, %s2122_s17  ;;  %v1292_v38 = vmul.f32 %v1291_v27, %v2563_v49 }
0x151c   :  { %v1983_v28 = vpop.eup %1982 }
0x151d   :  { %v1367_v29 = vsel %vm2284_vm4, %v1981_v35, %v1983_v28 }
0x151e   :  { %1373 = vrot.lane.b32.xlu0 %v1367_v29, %s2122_s17  ;;  %v1371_v42 = vmul.f32 %v1369_v39, %v1367_v29 }
0x158c   :  { %v1295_v30 = vpop.permute.xlu1 %1294 }
0x158d   :  { %v1297_v34 = vmul.f32 %v1295_v30, %v1291_v27 }
0x158f   :  { %1299 = vrot.lane.b32.xlu1 %v1297_v34, %s2129_s10 }
0x1590   :  { %v1374_v36 = vpop.permute.xlu0 %1373 }
0x1591   :  { %v1376_v37 = vmul.f32 %v1374_v36, %v1367_v29 }
0x1593   :  { %1378 = vrot.lane.b32.xlu0 %v1376_v37, %s2129_s10 }
0x1601   :  { %v1300_v10 = vpop.permute.xlu1 %1299 }
0x1602   :  { %v1302_v40 = vadd.f32 %v1300_v10, %v1292_v38 }
0x1604   :  { %1984 = vtanh.f32 %v1302_v40 }
0x1605   :  { %v1379_v43 = vpop.permute.xlu0 %1378 }
0x1606   :  { %v1381_v44 = vadd.f32 %v1379_v43, %v1371_v42 }
0x1608   :  { %1986 = vtanh.f32 %v1381_v44 }
0x160e   :  { %v1985_v45 = vpop.eup %1984 }
0x160f   :  { %1305 = vrot.lane.b32.xlu1 %v1985_v45, %s2122_s17 }
0x1612   :  { %v1987_v46 = vpop.eup %1986 }
0x1613   :  { %1384 = vrot.lane.b32.xlu0 %v1987_v46, %s2122_s17 }
0x1681   :  { %v1306_v47 = vpop.permute.xlu1 %1305 }
0x1682   :  { %v1308_v48 = vmul.f32 %v1306_v47, %v1291_v27 }
0x1684   :  { %v1389_v50 = vpack.c.bf16 %v1308_v48, %v1308_v48 }
0x1685   :  { %v1385_v52 = vpop.permute.xlu0 %1384 }
0x1686   :  { %v1387_v49 = vmul.f32 %v1385_v52, %v1367_v29  ;;  %v1394_v53 = vrot.slane %v1389_v50, 5 }
0x1688   :  { %v1388_v54 = vpack.c.bf16 %v1387_v49, %v1387_v49  ;;  %1395 = vrot.lane.b32.xlu0 %v1394_v53, %s2122_s17 }
0x168a   :  { %1391 = vrot.lane.b32.xlu1 %v1388_v54, %s2129_s10 }
0x16fa   :  { %v1396_v51 = vpop.permute.xlu0 %1395 }
0x16fc   :  { %v1392_v55 = vpop.permute.xlu1 %1391 }
0x16fd   :  { %v1399_v6 = vsel %vm189_vm5, %v1392_v55, %v1396_v51 }
0x16fe   :  { %v1401_v56 = vrot.slane %v1399_v6, 3 }
0x1700   :  { %1836 = vmatmul.mubr.msk.bf16.vlgmr.msra.gmra.mrb[32].mxu1 %vm290_vm6, %v1401_v56 }
0x17d3   :  { %v1439_v57 = vpop.f32.mrb[32].mxu1 }
0x17d4   :  { %v1440_v59 = vadd.f32 %v2001_v58, %v1439_v57  ;;  %v1837_v60 = vpop.f32.mrb[33].mxu1 }
0x17d5   :  { %v1442_v61 = vpop.f32.mrb[34].mxu1 }
0x17d6   :  { %v1599_v62 = vmul.f32 -1.442695, %v1440_v59  ;;  %v1838_v63 = vpop.f32.mrb[35].mxu1 }
0x17d8   :  { %1988 = vpow2.f32 %v1599_v62 }
0x17d9   :  { %1990 = vtanh.f32 %v1440_v59 }
0x17e2   :  { %v1989_v2 = vpop.eup %1988 }
0x17e3   :  { %v1449_v3 = vadd.f32 1.0, %v1989_v2  ;;  %v1991_v5 = vpop.eup %1990 }
0x17e5   :  { %1992 = vrcp.f32 %v1449_v3 }
0x17ef   :  { %v1993_v11 = vpop.eup %1992 }
0x17f0   :  { %v1452_v12 = vsel %vm2284_vm4, %v1991_v5, %v1993_v11 }
0x17f1   :  { %1455 = vrot.lane.b32.xlu1 %v1452_v12, %s2122_s17  ;;  %v1453_v16 = vmul.f32 %v1452_v12, %v1302_v40 }
0x1863   :  { %v1456_v7 = vpop.permute.xlu1 %1455 }
0x1864   :  { %v1458_v9 = vmul.f32 %v1456_v7, %v1452_v12 }
0x1866   :  { %1460 = vrot.lane.b32.xlu0 %v1458_v9, %s2129_s10 }
0x18d8   :  { %v1461_v19 = vpop.permute.xlu0 %1460 }
0x18d9   :  { %v1463_v13 = vadd.f32 %v1461_v19, %v1453_v16 }
0x18db   :  { %1994 = vtanh.f32 %v1463_v13 }
0x18e5   :  { %v1995_v18 = vpop.eup %1994 }
0x18e6   :  { %1466 = vrot.lane.b32.xlu1 %v1995_v18, %s2122_s17  ;;  %s2090_s17 = scalar_lea.vmem %s1548_s6, 32 }
0x18e7   :  { %p2091_p4 = scmp.ne.s32.totalorder %s1548_s6, %s2090_s17  ;;  %p2096_p6 = scmp.lt.s32.totalorder %s2090_s17, %s2090_s17 }
0x18e9   :  { %p2097_p7 = por %p2096_p6, %p2095_p5 }
0x18eb   :  { %p2098_p8 = pnand %p2097_p7, %p2091_p4 }
0x1958   :  { %v1467_v1 = vpop.permute.xlu1 %1466 }
0x1959   :  { %v1469_v31 = vmul.f32 %v1467_v1, %v1452_v12 }
0x195b   :  { %v1470_v14 = vpack.c.bf16 %v1469_v31, %v1469_v31 }
0x195d   :  { %1483 = vrot.lane.b32.xlu0 %v1470_v14, %s2129_s10 }
0x19cf   :  { %v1484_v32 = vpop.permute.xlu0 %1483 }
0x19d0   :  { %1844 = vmatmul.mubr.msk.bf16.vlgmr.msra.gmra.mrb[32].mxu0 %vm189_vm5, %v1484_v32 }
0x1aa3   :  { %v1534_v23 = vpop.f32.mrb[32].mxu0 }
0x1aa4   :  { %v1535_v0 = vadd.f32 %v1600_v21, %v1534_v23  ;;  %v1845_v24 = vpop.f32.mrb[33].mxu0 }
0x1aa5   :  { %v1537_v4 = vpop.f32.mrb[34].mxu0 }
0x1aa6   :  { %1540 = vst [vmem:[#allocation10] sm:$0x3] %v1535_v0  ;;  %v1846_v17 = vpop.f32.mrb[35].mxu0 }
0x1aa7   :  { %2101 = shalt.err (!%p2098_p8)
}
0x1aa8   :  { %s2102_s7 = scalar_lea.hbm %s2645_s8, 32 }
0x1aa9   :  { %p2103_p9 = scmp.ne.s32.totalorder %s2645_s8, %s2102_s7  ;;  %p2106_p10 = scmp.lt.u32.totalorder %s2102_s7, %s2645_s8 }
0x1aab   :  { %p2108_p11 = pnand %p2106_p10, %p2103_p9 }
0x1aad   :  { %2111 = shalt.err (!%p2108_p11)
}
0x1aae   :  { %1550 = dma.vmem_to_hbm [thread:$0]  %s1548_s6, 32, %s2645_s8, [#allocation4]  }
0x1aaf   :  { %2118 = dma.done.wait [#allocation4], 32  }
0x1ab0   :  { %2119 = vsyncadd [#allocation4], 4294967264 }
0x1ab1   :  { %1554 = vsyncpa [#allocation3], 1 }
0x1ab2   :  { %1555 = vsyncpa [#allocation6], 1 }
0x1ab3   :  { %1556 = vsyncpa [#allocation9], 1 }
0x1ab4   :  { %1557 = vsyncpa [#allocation4], 1 }

</bundles_post_ra>
